<compile_context>
chip_gen: v7x
topology: tpu7x:2x2x1
jax: 0.10.0
libtpu: 0.0.40
codegen_flags: <defaults>
</compile_context>

<pallas_src>
import functools
from typing import NamedTuple

import jax
import jax.numpy as jnp
import numpy as np
from jax.experimental import pallas as pl
from jax.experimental.pallas import tpu as pltpu

HIDDEN = 100
NLEN = 5                          # matches the module default
N_LAYERS = 1 + 1 + NLEN + 1 + 1   # = 9 Linear layers, ReLU after all but last

LANE = 128


def _round_up(n, m):
    return ((n + m - 1) // m) * m


def _pad_to(a, shape):
    return jnp.pad(a, [(0, t - s) for s, t in zip(a.shape, shape)])


class MLPParams(NamedTuple):
    w0: jax.Array        # (xlen, 128)           compute dtype (bf16/f32)
    w_stack: jax.Array   # (N_LAYERS-1, 128, 128) compute dtype (bf16/f32)
    b_stack: jax.Array   # (N_LAYERS, 1, 128)    float32
    ylen: int            # true output width (static)


def prepare_params(weights, biases, compute_dtype=jnp.bfloat16):
    """One-time parameter prep: pad to lane-dense shapes, stack, cast.

    Call once and cache the result; do NOT call per forward pass (the padding
    and casts would otherwise be recomputed inside the latency-critical path).
    Zero-padded weight rows / bias columns stay exactly zero through ReLU, so
    padding is numerically inert.
    """
    assert len(weights) == N_LAYERS and len(biases) == N_LAYERS
    hid_p = _round_up(HIDDEN, LANE)            # 100 -> 128
    xlen = int(weights[0].shape[0])
    ylen = int(weights[-1].shape[1])

    w0 = _pad_to(jnp.asarray(weights[0], jnp.float32),
                 (xlen, hid_p)).astype(compute_dtype)
    w_stack = jnp.stack([
        _pad_to(jnp.asarray(weights[i], jnp.float32), (hid_p, hid_p))
        for i in range(1, N_LAYERS)
    ]).astype(compute_dtype)                   # (8, 128, 128)
    b_stack = jnp.stack([
        _pad_to(jnp.asarray(biases[i], jnp.float32).reshape(1, -1), (1, hid_p))
        for i in range(N_LAYERS)
    ])                                          # (9, 1, 128), f32
    return MLPParams(w0=w0, w_stack=w_stack, b_stack=b_stack, ylen=ylen)


def _mlp_kernel(x_ref, w0_ref, ws_ref, bs_ref, o_ref):
    """Full 9-layer MLP forward for one (tile_b, xlen) batch tile.

    x_ref:  (tile_b, xlen)              input activations
    w0_ref: (xlen, 128)                 layer-0 weight (K unpadded)
    ws_ref: (8, 128, 128)               layers 1..8 stacked weights
    bs_ref: (9, 1, 128)                 stacked biases (f32)
    o_ref:  (tile_b, ylen)              unpadded output
    Compute dtype for MXU operands is inferred from the stored weight dtype;
    accumulation is always float32.
    """
    cdt = w0_ref.dtype
    n_mid = ws_ref.shape[0]                     # = N_LAYERS - 1

    # Layer 0: Linear + ReLU (contracts over K = xlen, no K padding).
    h = jnp.dot(x_ref[...].astype(cdt), w0_ref[...],
                preferred_element_type=jnp.float32) + bs_ref[0]
    h = jnp.maximum(h, 0.0)

    # Layers 1 .. N_LAYERS-2: Linear + ReLU, statically unrolled.
    for i in range(n_mid - 1):
        h = jnp.dot(h.astype(cdt), ws_ref[i],
                    preferred_element_type=jnp.float32) + bs_ref[i + 1]
        h = jnp.maximum(h, 0.0)

    # Final Linear (no ReLU); drop the padded output columns before storing.
    out = jnp.dot(h.astype(cdt), ws_ref[n_mid - 1],
                  preferred_element_type=jnp.float32) + bs_ref[n_mid]
    o_ref[...] = out[:, :o_ref.shape[-1]].astype(o_ref.dtype)


@functools.partial(jax.jit, static_argnames=("ylen", "n_tiles", "tile_b"))
def _forward_impl(x, w0, w_stack, b_stack, *, ylen, n_tiles, tile_b):
    B, xlen = x.shape
    hid_p = w0.shape[1]
    n_mid = w_stack.shape[0]
    B_pad = n_tiles * tile_b

    x = x.astype(jnp.float32)
    if B_pad != B:                     # static branch; no-op for aligned B
        x = jnp.pad(x, ((0, B_pad - B), (0, 0)))

    flops = 2 * B_pad * (xlen * hid_p + n_mid * hid_p * hid_p)
    bytes_accessed = (
        B_pad * xlen * 4
        + w0.size * w0.dtype.itemsize
        + w_stack.size * w_stack.dtype.itemsize
        + b_stack.size * b_stack.dtype.itemsize
        + B_pad * ylen * 4)

    out = pl.pallas_call(
        _mlp_kernel,
        out_shape=jax.ShapeDtypeStruct((B_pad, ylen), jnp.float32),
        grid_spec=pltpu.PrefetchScalarGridSpec(
            num_scalar_prefetch=0,
            grid=(n_tiles,),
            in_specs=[
                pl.BlockSpec((tile_b, xlen), lambda i: (i, 0)),      # x tile
                pl.BlockSpec((xlen, hid_p), lambda i: (0, 0)),       # w0
                pl.BlockSpec((n_mid, hid_p, hid_p), lambda i: (0, 0, 0)),  # w1..8
                pl.BlockSpec((n_mid + 1, 1, hid_p), lambda i: (0, 0, 0)),  # biases
            ],
            out_specs=pl.BlockSpec((tile_b, ylen), lambda i: (i, 0)),
        ),
        compiler_params=pltpu.CompilerParams(
            dimension_semantics=("parallel",),
        ),
        cost_estimate=pl.CostEstimate(
            flops=flops, transcendentals=0, bytes_accessed=bytes_accessed),
    )(x, w0, w_stack, b_stack)

    if B_pad != B:
        out = out[:B]
    return out


def _tensorcores_per_chip():
    """1 for v5e/v6e (single TC), 2 for v7x / v4 / v5p style megacore chips."""
    try:
        kind = jax.devices()[0].device_kind.lower()
    except Exception:
        return 1
    if "v5 lite" in kind or "v5e" in kind or "v6" in kind:
        return 1
    if "v7" in kind or "7x" in kind or "v4" in kind or "v5p" in kind:
        return 2
    return 1


def _choose_tiling(batch, num_tc, max_tile_b):
    """Pick (n_tiles, tile_b, padded_batch) for the 1-D batch grid."""
    b8 = _round_up(batch, 8)
    n_tiles = max(num_tc, pl.cdiv(b8, max_tile_b))
    tile_b = _round_up(pl.cdiv(b8, n_tiles), 8)
    n_tiles = pl.cdiv(b8, tile_b)
    return n_tiles, tile_b, n_tiles * tile_b


def dynamic_nn_stage2_forward(x, params: MLPParams, *, max_tile_b=256):
    """Pallas forward pass of DynamicNNstage2.

    x:      (B, xlen) float32
    params: MLPParams from prepare_params (call once, reuse)
    max_tile_b: largest batch rows per grid step; 256 keeps the (tile_b, 128)
      f32 activation chain within the 64-vreg file (sweep up to 512 on v6e if
      the bundle dump shows no vld/vst spill pressure).
    """
    n_tiles, tile_b, _ = _choose_tiling(x.shape[0], _tensorcores_per_chip(),
                                        max_tile_b)
    return _forward_impl(x, params.w0, params.w_stack, params.b_stack,
                         ylen=params.ylen, n_tiles=n_tiles, tile_b=tile_b)


def init_params(key, xlen, ylen):
    """Deterministic init mimicking nn.Linear default (uniform +/- 1/sqrt(fan_in))."""
    dims = [xlen] + [HIDDEN] * (N_LAYERS - 1) + [ylen]
    weights, biases = [], []
    for i in range(N_LAYERS):
        fan_in, fan_out = dims[i], dims[i + 1]
        key, kw, kb = jax.random.split(key, 3)
        bound = 1.0 / np.sqrt(fan_in)
        w = jax.random.uniform(kw, (fan_in, fan_out), jnp.float32, -bound, bound)
        b = jax.random.uniform(kb, (1, fan_out), jnp.float32, -bound, bound)
        weights.append(w)
        biases.append(b)
    return weights, biases


def reference_forward_f64(x, weights, biases):
    """Float64 NumPy reference matching the PyTorch module semantics."""
    h = np.asarray(x, np.float64)
    ws = [np.asarray(w, np.float64) for w in weights]
    bs = [np.asarray(b, np.float64) for b in biases]
    for i in range(N_LAYERS - 1):
        h = np.maximum(h @ ws[i] + bs[i], 0.0)
    return h @ ws[-1] + bs[-1]


if __name__ == "__main__":
    xlen, ylen = 32, 8
    batch = 256

    key = jax.random.PRNGKey(0)
    key, kx = jax.random.split(key)
    x = jax.random.normal(kx, (batch, xlen), jnp.float32)
    weights, biases = init_params(key, xlen, ylen)

    ref = reference_forward_f64(np.asarray(x), weights, biases)

    # Fast path: bf16 MXU operands, f32 accumulation (one-time param prep).
    params_bf16 = prepare_params(weights, biases, compute_dtype=jnp.bfloat16)
    out_bf16 = jax.block_until_ready(dynamic_nn_stage2_forward(x, params_bf16))
    # bf16 operand rounding across 9 chained layers vs the f64 reference.
    np.testing.assert_allclose(np.asarray(out_bf16), ref, rtol=5e-2, atol=1e-2)

    # f32-operand path: validates that padding / stacking is numerically exact.
    params_f32 = prepare_params(weights, biases, compute_dtype=jnp.float32)
    out_f32 = jax.block_until_ready(dynamic_nn_stage2_forward(x, params_f32))
    np.testing.assert_allclose(np.asarray(out_f32), ref, rtol=1e-4, atol=1e-4)

    # Non-divisible-batch path (cdiv grid + batch pad / output row slice).
    x2 = x[:100]
    out2 = jax.block_until_ready(dynamic_nn_stage2_forward(x2, params_f32))
    np.testing.assert_allclose(
        np.asarray(out2),
        reference_forward_f64(np.asarray(x2), weights, biases),
        rtol=1e-4, atol=1e-4)

    print("KERNEL_OK")
</pallas_src>

<mosaic_0001>
module attributes {stable_mosaic.version = 11 : i64} {
  func.func @_mlp_kernel(%arg0: i32, %arg1: memref<256x32xf32, #tpu.memory_space<vmem>>, %arg2: memref<32x128xbf16, #tpu.memory_space<vmem>>, %arg3: memref<8x128x128xbf16, #tpu.memory_space<vmem>>, %arg4: memref<9x1x128xf32, #tpu.memory_space<vmem>>, %arg5: memref<256x8xf32, #tpu.memory_space<vmem>>) attributes {dimension_semantics = [#tpu.dimension_semantics<parallel>], iteration_bounds = array<i64: 1>, scalar_prefetch = 0 : i64, scratch_operands = 0 : i64, tpu.core_type = #tpu.core_type<tc>, window_params = [{transform_indices = @transform_0, window_bounds = array<i64: 256, 32>}, {pipeline_mode = #tpu.pipeline_mode<synchronous>, transform_indices = @transform_1, window_bounds = array<i64: 32, 128>}, {pipeline_mode = #tpu.pipeline_mode<synchronous>, transform_indices = @transform_2, window_bounds = array<i64: 8, 128, 128>}, {pipeline_mode = #tpu.pipeline_mode<synchronous>, transform_indices = @transform_3, window_bounds = array<i64: 9, 1, 128>}, {transform_indices = @transform_4, window_bounds = array<i64: 256, 8>}]} {
    %c0 = arith.constant 0 : index
    %c0_0 = arith.constant 0 : index
    %0 = vector.load %arg1[%c0, %c0_0] : memref<256x32xf32, #tpu.memory_space<vmem>>, vector<256x32xf32>
    %1 = arith.truncf %0 : vector<256x32xf32> to vector<256x32xbf16>
    %c0_1 = arith.constant 0 : index
    %c0_2 = arith.constant 0 : index
    %2 = vector.load %arg2[%c0_1, %c0_2] : memref<32x128xbf16, #tpu.memory_space<vmem>>, vector<32x128xbf16>
    %cst = arith.constant dense<0.000000e+00> : vector<256x128xf32>
    %3 = tpu.matmul %1, %2, %cst {dimension_numbers = #tpu.dot_dimension_numbers<[1], [0], [0], [1], [0, 0, 1, 1], [], []>} : vector<256x32xbf16>, vector<32x128xbf16>, vector<256x128xf32> -> vector<256x128xf32>
    %c0_3 = arith.constant 0 : index
    %c0_4 = arith.constant 0 : index
    %c0_5 = arith.constant 0 : index
    %4 = vector.load %arg4[%c0_3, %c0_4, %c0_5] : memref<9x1x128xf32, #tpu.memory_space<vmem>>, vector<1x1x128xf32>
    %5 = vector.shape_cast %4 : vector<1x1x128xf32> to vector<1x128xf32>
    %6 = vector.broadcast %5 : vector<1x128xf32> to vector<256x128xf32>
    %7 = arith.addf %3, %6 : vector<256x128xf32>
    %cst_6 = arith.constant 0.000000e+00 : f32
    %8 = vector.broadcast %cst_6 : f32 to vector<256x128xf32>
    %9 = arith.maximumf %7, %8 : vector<256x128xf32>
    %10 = arith.truncf %9 : vector<256x128xf32> to vector<256x128xbf16>
    %c0_7 = arith.constant 0 : index
    %c0_8 = arith.constant 0 : index
    %c0_9 = arith.constant 0 : index
    %11 = vector.load %arg3[%c0_7, %c0_8, %c0_9] : memref<8x128x128xbf16, #tpu.memory_space<vmem>>, vector<1x128x128xbf16>
    %12 = vector.shape_cast %11 : vector<1x128x128xbf16> to vector<128x128xbf16>
    %cst_10 = arith.constant dense<0.000000e+00> : vector<256x128xf32>
    %13 = tpu.matmul %10, %12, %cst_10 {dimension_numbers = #tpu.dot_dimension_numbers<[1], [0], [0], [1], [0, 0, 1, 1], [], []>} : vector<256x128xbf16>, vector<128x128xbf16>, vector<256x128xf32> -> vector<256x128xf32>
    %c1 = arith.constant 1 : index
    %c0_11 = arith.constant 0 : index
    %c0_12 = arith.constant 0 : index
    %14 = vector.load %arg4[%c1, %c0_11, %c0_12] : memref<9x1x128xf32, #tpu.memory_space<vmem>>, vector<1x1x128xf32>
    %15 = vector.shape_cast %14 : vector<1x1x128xf32> to vector<1x128xf32>
    %16 = vector.broadcast %15 : vector<1x128xf32> to vector<256x128xf32>
    %17 = arith.addf %13, %16 : vector<256x128xf32>
    %cst_13 = arith.constant 0.000000e+00 : f32
    %18 = vector.broadcast %cst_13 : f32 to vector<256x128xf32>
    %19 = arith.maximumf %17, %18 : vector<256x128xf32>
    %20 = arith.truncf %19 : vector<256x128xf32> to vector<256x128xbf16>
    %c1_14 = arith.constant 1 : index
    %c0_15 = arith.constant 0 : index
    %c0_16 = arith.constant 0 : index
    %21 = vector.load %arg3[%c1_14, %c0_15, %c0_16] : memref<8x128x128xbf16, #tpu.memory_space<vmem>>, vector<1x128x128xbf16>
    %22 = vector.shape_cast %21 : vector<1x128x128xbf16> to vector<128x128xbf16>
    %cst_17 = arith.constant dense<0.000000e+00> : vector<256x128xf32>
    %23 = tpu.matmul %20, %22, %cst_17 {dimension_numbers = #tpu.dot_dimension_numbers<[1], [0], [0], [1], [0, 0, 1, 1], [], []>} : vector<256x128xbf16>, vector<128x128xbf16>, vector<256x128xf32> -> vector<256x128xf32>
    %c2 = arith.constant 2 : index
    %c0_18 = arith.constant 0 : index
    %c0_19 = arith.constant 0 : index
    %24 = vector.load %arg4[%c2, %c0_18, %c0_19] : memref<9x1x128xf32, #tpu.memory_space<vmem>>, vector<1x1x128xf32>
    %25 = vector.shape_cast %24 : vector<1x1x128xf32> to vector<1x128xf32>
    %26 = vector.broadcast %25 : vector<1x128xf32> to vector<256x128xf32>
    %27 = arith.addf %23, %26 : vector<256x128xf32>
    %cst_20 = arith.constant 0.000000e+00 : f32
    %28 = vector.broadcast %cst_20 : f32 to vector<256x128xf32>
    %29 = arith.maximumf %27, %28 : vector<256x128xf32>
    %30 = arith.truncf %29 : vector<256x128xf32> to vector<256x128xbf16>
    %c2_21 = arith.constant 2 : index
    %c0_22 = arith.constant 0 : index
    %c0_23 = arith.constant 0 : index
    %31 = vector.load %arg3[%c2_21, %c0_22, %c0_23] : memref<8x128x128xbf16, #tpu.memory_space<vmem>>, vector<1x128x128xbf16>
    %32 = vector.shape_cast %31 : vector<1x128x128xbf16> to vector<128x128xbf16>
    %cst_24 = arith.constant dense<0.000000e+00> : vector<256x128xf32>
    %33 = tpu.matmul %30, %32, %cst_24 {dimension_numbers = #tpu.dot_dimension_numbers<[1], [0], [0], [1], [0, 0, 1, 1], [], []>} : vector<256x128xbf16>, vector<128x128xbf16>, vector<256x128xf32> -> vector<256x128xf32>
    %c3 = arith.constant 3 : index
    %c0_25 = arith.constant 0 : index
    %c0_26 = arith.constant 0 : index
    %34 = vector.load %arg4[%c3, %c0_25, %c0_26] : memref<9x1x128xf32, #tpu.memory_space<vmem>>, vector<1x1x128xf32>
    %35 = vector.shape_cast %34 : vector<1x1x128xf32> to vector<1x128xf32>
    %36 = vector.broadcast %35 : vector<1x128xf32> to vector<256x128xf32>
    %37 = arith.addf %33, %36 : vector<256x128xf32>
    %cst_27 = arith.constant 0.000000e+00 : f32
    %38 = vector.broadcast %cst_27 : f32 to vector<256x128xf32>
    %39 = arith.maximumf %37, %38 : vector<256x128xf32>
    %40 = arith.truncf %39 : vector<256x128xf32> to vector<256x128xbf16>
    %c3_28 = arith.constant 3 : index
    %c0_29 = arith.constant 0 : index
    %c0_30 = arith.constant 0 : index
    %41 = vector.load %arg3[%c3_28, %c0_29, %c0_30] : memref<8x128x128xbf16, #tpu.memory_space<vmem>>, vector<1x128x128xbf16>
    %42 = vector.shape_cast %41 : vector<1x128x128xbf16> to vector<128x128xbf16>
    %cst_31 = arith.constant dense<0.000000e+00> : vector<256x128xf32>
    %43 = tpu.matmul %40, %42, %cst_31 {dimension_numbers = #tpu.dot_dimension_numbers<[1], [0], [0], [1], [0, 0, 1, 1], [], []>} : vector<256x128xbf16>, vector<128x128xbf16>, vector<256x128xf32> -> vector<256x128xf32>
    %c4 = arith.constant 4 : index
    %c0_32 = arith.constant 0 : index
    %c0_33 = arith.constant 0 : index
    %44 = vector.load %arg4[%c4, %c0_32, %c0_33] : memref<9x1x128xf32, #tpu.memory_space<vmem>>, vector<1x1x128xf32>
    %45 = vector.shape_cast %44 : vector<1x1x128xf32> to vector<1x128xf32>
    %46 = vector.broadcast %45 : vector<1x128xf32> to vector<256x128xf32>
    %47 = arith.addf %43, %46 : vector<256x128xf32>
    %cst_34 = arith.constant 0.000000e+00 : f32
    %48 = vector.broadcast %cst_34 : f32 to vector<256x128xf32>
    %49 = arith.maximumf %47, %48 : vector<256x128xf32>
    %50 = arith.truncf %49 : vector<256x128xf32> to vector<256x128xbf16>
    %c4_35 = arith.constant 4 : index
    %c0_36 = arith.constant 0 : index
    %c0_37 = arith.constant 0 : index
    %51 = vector.load %arg3[%c4_35, %c0_36, %c0_37] : memref<8x128x128xbf16, #tpu.memory_space<vmem>>, vector<1x128x128xbf16>
    %52 = vector.shape_cast %51 : vector<1x128x128xbf16> to vector<128x128xbf16>
    %cst_38 = arith.constant dense<0.000000e+00> : vector<256x128xf32>
    %53 = tpu.matmul %50, %52, %cst_38 {dimension_numbers = #tpu.dot_dimension_numbers<[1], [0], [0], [1], [0, 0, 1, 1], [], []>} : vector<256x128xbf16>, vector<128x128xbf16>, vector<256x128xf32> -> vector<256x128xf32>
    %c5 = arith.constant 5 : index
    %c0_39 = arith.constant 0 : index
    %c0_40 = arith.constant 0 : index
    %54 = vector.load %arg4[%c5, %c0_39, %c0_40] : memref<9x1x128xf32, #tpu.memory_space<vmem>>, vector<1x1x128xf32>
    %55 = vector.shape_cast %54 : vector<1x1x128xf32> to vector<1x128xf32>
    %56 = vector.broadcast %55 : vector<1x128xf32> to vector<256x128xf32>
    %57 = arith.addf %53, %56 : vector<256x128xf32>
    %cst_41 = arith.constant 0.000000e+00 : f32
    %58 = vector.broadcast %cst_41 : f32 to vector<256x128xf32>
    %59 = arith.maximumf %57, %58 : vector<256x128xf32>
    %60 = arith.truncf %59 : vector<256x128xf32> to vector<256x128xbf16>
    %c5_42 = arith.constant 5 : index
    %c0_43 = arith.constant 0 : index
    %c0_44 = arith.constant 0 : index
    %61 = vector.load %arg3[%c5_42, %c0_43, %c0_44] : memref<8x128x128xbf16, #tpu.memory_space<vmem>>, vector<1x128x128xbf16>
    %62 = vector.shape_cast %61 : vector<1x128x128xbf16> to vector<128x128xbf16>
    %cst_45 = arith.constant dense<0.000000e+00> : vector<256x128xf32>
    %63 = tpu.matmul %60, %62, %cst_45 {dimension_numbers = #tpu.dot_dimension_numbers<[1], [0], [0], [1], [0, 0, 1, 1], [], []>} : vector<256x128xbf16>, vector<128x128xbf16>, vector<256x128xf32> -> vector<256x128xf32>
    %c6 = arith.constant 6 : index
    %c0_46 = arith.constant 0 : index
    %c0_47 = arith.constant 0 : index
    %64 = vector.load %arg4[%c6, %c0_46, %c0_47] : memref<9x1x128xf32, #tpu.memory_space<vmem>>, vector<1x1x128xf32>
    %65 = vector.shape_cast %64 : vector<1x1x128xf32> to vector<1x128xf32>
    %66 = vector.broadcast %65 : vector<1x128xf32> to vector<256x128xf32>
    %67 = arith.addf %63, %66 : vector<256x128xf32>
    %cst_48 = arith.constant 0.000000e+00 : f32
    %68 = vector.broadcast %cst_48 : f32 to vector<256x128xf32>
    %69 = arith.maximumf %67, %68 : vector<256x128xf32>
    %70 = arith.truncf %69 : vector<256x128xf32> to vector<256x128xbf16>
    %c6_49 = arith.constant 6 : index
    %c0_50 = arith.constant 0 : index
    %c0_51 = arith.constant 0 : index
    %71 = vector.load %arg3[%c6_49, %c0_50, %c0_51] : memref<8x128x128xbf16, #tpu.memory_space<vmem>>, vector<1x128x128xbf16>
    %72 = vector.shape_cast %71 : vector<1x128x128xbf16> to vector<128x128xbf16>
    %cst_52 = arith.constant dense<0.000000e+00> : vector<256x128xf32>
    %73 = tpu.matmul %70, %72, %cst_52 {dimension_numbers = #tpu.dot_dimension_numbers<[1], [0], [0], [1], [0, 0, 1, 1], [], []>} : vector<256x128xbf16>, vector<128x128xbf16>, vector<256x128xf32> -> vector<256x128xf32>
    %c7 = arith.constant 7 : index
    %c0_53 = arith.constant 0 : index
    %c0_54 = arith.constant 0 : index
    %74 = vector.load %arg4[%c7, %c0_53, %c0_54] : memref<9x1x128xf32, #tpu.memory_space<vmem>>, vector<1x1x128xf32>
    %75 = vector.shape_cast %74 : vector<1x1x128xf32> to vector<1x128xf32>
    %76 = vector.broadcast %75 : vector<1x128xf32> to vector<256x128xf32>
    %77 = arith.addf %73, %76 : vector<256x128xf32>
    %cst_55 = arith.constant 0.000000e+00 : f32
    %78 = vector.broadcast %cst_55 : f32 to vector<256x128xf32>
    %79 = arith.maximumf %77, %78 : vector<256x128xf32>
    %80 = arith.truncf %79 : vector<256x128xf32> to vector<256x128xbf16>
    %c7_56 = arith.constant 7 : index
    %c0_57 = arith.constant 0 : index
    %c0_58 = arith.constant 0 : index
    %81 = vector.load %arg3[%c7_56, %c0_57, %c0_58] : memref<8x128x128xbf16, #tpu.memory_space<vmem>>, vector<1x128x128xbf16>
    %82 = vector.shape_cast %81 : vector<1x128x128xbf16> to vector<128x128xbf16>
    %cst_59 = arith.constant dense<0.000000e+00> : vector<256x128xf32>
    %83 = tpu.matmul %80, %82, %cst_59 {dimension_numbers = #tpu.dot_dimension_numbers<[1], [0], [0], [1], [0, 0, 1, 1], [], []>} : vector<256x128xbf16>, vector<128x128xbf16>, vector<256x128xf32> -> vector<256x128xf32>
    %c8 = arith.constant 8 : index
    %c0_60 = arith.constant 0 : index
    %c0_61 = arith.constant 0 : index
    %84 = vector.load %arg4[%c8, %c0_60, %c0_61] : memref<9x1x128xf32, #tpu.memory_space<vmem>>, vector<1x1x128xf32>
    %85 = vector.shape_cast %84 : vector<1x1x128xf32> to vector<1x128xf32>
    %86 = vector.broadcast %85 : vector<1x128xf32> to vector<256x128xf32>
    %87 = arith.addf %83, %86 : vector<256x128xf32>
    %88 = vector.extract_strided_slice %87 {offsets = [0, 0], sizes = [256, 8], strides = [1, 1]} : vector<256x128xf32> to vector<256x8xf32>
    %c0_62 = arith.constant 0 : index
    %c0_63 = arith.constant 0 : index
    %89 = vector.load %arg5[%c0_62, %c0_63] : memref<256x8xf32, #tpu.memory_space<vmem>>, vector<256x8xf32>
    tpu.vector_store %arg5[%c0_62, %c0_63], %88 {strides = array<i32>} : memref<256x8xf32, #tpu.memory_space<vmem>>, vector<256x8xf32>,
    return
  }
  func.func @transform_0(%arg0: i32) -> (i32, i32) {
    %c0_i32 = arith.constant 0 : i32
    %c0_i32_0 = arith.constant 0 : i32
    return %arg0, %c0_i32 : i32, i32
  }
  func.func @transform_1(%arg0: i32) -> (i32, i32) {
    %c0_i32 = arith.constant 0 : i32
    %c0_i32_0 = arith.constant 0 : i32
    %c0_i32_1 = arith.constant 0 : i32
    return %c0_i32, %c0_i32_0 : i32, i32
  }
  func.func @transform_2(%arg0: i32) -> (i32, i32, i32) {
    %c0_i32 = arith.constant 0 : i32
    %c0_i32_0 = arith.constant 0 : i32
    %c0_i32_1 = arith.constant 0 : i32
    %c0_i32_2 = arith.constant 0 : i32
    return %c0_i32, %c0_i32_0, %c0_i32_1 : i32, i32, i32
  }
  func.func @transform_3(%arg0: i32) -> (i32, i32, i32) {
    %c0_i32 = arith.constant 0 : i32
    %c0_i32_0 = arith.constant 0 : i32
    %c0_i32_1 = arith.constant 0 : i32
    %c0_i32_2 = arith.constant 0 : i32
    return %c0_i32, %c0_i32_0, %c0_i32_1 : i32, i32, i32
  }
  func.func @transform_4(%arg0: i32) -> (i32, i32) {
    %c0_i32 = arith.constant 0 : i32
    %c0_i32_0 = arith.constant 0 : i32
    return %arg0, %c0_i32 : i32, i32
  }
}

</mosaic_0001>

<bundles_post_ra>
// kernel: _forward_impl.1
= control target key start
LH: loop header
LB: loop body
LE: loop exit
PB: predicated region body
PF: predicated region fallthrough
CT: control target
= control target key end

     0   :  { %9 = vsyncpa [#allocation3], 0  ;;  %s3432_s15 = smov [#allocation2]   ;;  %s4060_s0 = inlined_call_operand.vmem [shape: f32[256,32], index: 0, kind: input, shape index: {}]   ;;  %s4061_s1 = inlined_call_operand.vmem [shape: bf16[32,128], index: 1, kind: input, shape index: {}]   ;;  %s4062_s2 = inlined_call_operand.hbm [shape: bf16[8,128,128], index: 2, kind: input, shape index: {}]   ;;  %s4063_s3 = inlined_call_operand.vmem [shape: f32[9,1,128], index: 3, kind: input, shape index: {}]   ;;  %s4064_s4 = inlined_call_operand.vmem [shape: f32[256,8], index: 4, kind: output, shape index: {}]  }
   0x1   :  { %s19_s16 = sshll.u32 %s3432_s15, 4  ;;  %s3408_s19 = scalar_lea.hbm %s4062_s2, 8192  ;;  %s20_s16 = int_to_ptr.vmem [resolvable:$true] %s19_s16 }
   0x2   :  { %p3409_p0 = scmp.ne.s32.totalorder %s4062_s2, %s3408_s19  ;;  %p3412_p1 = scmp.lt.u32.totalorder %s3408_s19, %s4062_s2 }
   0x4   :  { %p3414_p2 = pnand %p3412_p1, %p3409_p0 }
   0x6   :  { %3417 = shalt.err (!%p3414_p2)
}
   0x7   :  { %s3418_s24 = scalar_lea.vmem %s20_s16, 8192  ;;  %p3423_p4 = scmp.lt.s32.totalorder %s20_s16, %s20_s16 }
   0x8   :  { %p3419_p3 = scmp.ne.s32.totalorder %s20_s16, %s3418_s24  ;;  %p3424_p5 = scmp.lt.s32.totalorder %s3418_s24, %s3418_s24 }
   0xa   :  { %p3425_p6 = por %p3424_p5, %p3423_p4 }
   0xc   :  { %p3426_p7 = pnand %p3425_p6, %p3419_p3 }
   0xe   :  { %3429 = shalt.err (!%p3426_p7)
}
   0xf   :  { %s3433_s25 = smov 64   ;;  %s3434_s26 = smov 4  }
  0x10   :  { %25 = dma.hbm_to_vmem [thread:$0]  %s4062_s2, 8192, %s20_s16, [#allocation3], %s3433_s25, %s3433_s25, %s3434_s26  }
  0x11   :  { %3430 = dma.done.wait [#allocation3], 8192  }
  0x12   :  { %3431 = vsyncadd [#allocation3], 4294959104  ;;  %v3342_v0 = vld [vmem:[%s4061_s1] sm:$0xff]   ;;  %v3343_v1 = vld [vmem:[%s4061_s1 + $0x8] sm:$0xff]   ;;  %vm103_vm0 = vcmask 261120   ;;  %vm2568_vm1 = vcmask 64512  }
  0x13   :  { %2915 = vmatprep.subr.bf16.mxu0 %v3342_v0  ;;  %v32_v2 = vld [vmem:[%s4060_s0] sm:$0xff]  ;;  %v33_v3 = vld [vmem:[%s4060_s0 + $0x8] sm:$0xff]  ;;  %3335 = vmatprep.subr.bf16.mxu1 %v3342_v0  ;;  %v34_v5 = vld [vmem:[%s4060_s0 + $0x10] sm:$0xff] }
  0x14   :  { %2916 = vmatpush3.bf16.msra.mxu0 %v3342_v0  ;;  %v64_v4 = vpack.c.bf16 %v33_v3, %v32_v2  ;;  %v35_v6 = vld [vmem:[%s4060_s0 + $0x18] sm:$0xff]  ;;  %3337 = vmatpush3.bf16.msra.mxu1 %v3342_v0  ;;  %v36_v7 = vld [vmem:[%s4060_s0 + $0x20] sm:$0xff]  ;;  %v37_v8 = vld [vmem:[%s4060_s0 + $0x28] sm:$0xff] }
  0x15   :  { %2917 = vmatprep.subr.bf16.mxu0 %v3343_v1  ;;  %3336 = vmatprep.subr.bf16.mxu1 %v3343_v1  ;;  %v65_v9 = vpack.c.bf16 %v35_v6, %v34_v5  ;;  %v66_v10 = vpack.c.bf16 %v37_v8, %v36_v7  ;;  %v48_v11 = vld [vmem:[%s4060_s0 + $0x80] sm:$0xff]  ;;  %v49_v12 = vld [vmem:[%s4060_s0 + $0x88] sm:$0xff]  ;;  %v50_v14 = vld [vmem:[%s4060_s0 + $0x90] sm:$0xff] }
  0x16   :  { %2919 = vmatprep.mubr.msk.bf16.mxu0 %vm103_vm0, %v64_v4  ;;  %v72_v13 = vpack.c.bf16 %v49_v12, %v48_v11  ;;  %v51_v15 = vld [vmem:[%s4060_s0 + $0x98] sm:$0xff]  ;;  %v52_v16 = vld [vmem:[%s4060_s0 + $0xa0] sm:$0xff]  ;;  %v53_v18 = vld [vmem:[%s4060_s0 + $0xa8] sm:$0xff] }
  0x17   :  { %v73_v17 = vpack.c.bf16 %v51_v15, %v50_v14  ;;  %v38_v19 = vld [vmem:[%s4060_s0 + $0x30] sm:$0xff]  ;;  %v39_v20 = vld [vmem:[%s4060_s0 + $0x38] sm:$0xff]  ;;  %v40_v21 = vld [vmem:[%s4060_s0 + $0x40] sm:$0xff]  ;;  %v74_v22 = vpack.c.bf16 %v53_v18, %v52_v16 }
  0x18   :  { %2918 = vmatpush3.bf16.msra.mxu0 %v3343_v1  ;;  %3338 = vmatpush3.bf16.msra.mxu1 %v3343_v1  ;;  %v41_v23 = vld [vmem:[%s4060_s0 + $0x48] sm:$0xff]  ;;  %v54_v24 = vld [vmem:[%s4060_s0 + $0xb0] sm:$0xff]  ;;  %v55_v25 = vld [vmem:[%s4060_s0 + $0xb8] sm:$0xff]  ;;  %v67_v29 = vpack.c.bf16 %v39_v20, %v38_v19 }
  0x19   :  { %2935 = vmatprep.mubr.msk.bf16.mxu1 %vm103_vm0, %v72_v13  ;;  %v56_v26 = vld [vmem:[%s4060_s0 + $0xc0] sm:$0xff]  ;;  %v57_v27 = vld [vmem:[%s4060_s0 + $0xc8] sm:$0xff]  ;;  %v68_v31 = vpack.c.bf16 %v41_v23, %v40_v21  ;;  %v75_v32 = vpack.c.bf16 %v55_v25, %v54_v24  ;;  %v42_v34 = vld [vmem:[%s4060_s0 + $0x50] sm:$0xff] }
  0x1a   :  { %v3344_v28 = vld [vmem:[#allocation2] sm:$0xff]   ;;  %v3345_v30 = vld [vmem:[#allocation2 + $0x8] sm:$0xff]   ;;  %v76_v33 = vpack.c.bf16 %v57_v27, %v56_v26  ;;  %v43_v35 = vld [vmem:[%s4060_s0 + $0x58] sm:$0xff] }
  0x1b   :  { %2920 = vmatmul.mubr.msk.bf16.vlgmr.msra.gmra.mrb[0].mxu0 %vm103_vm0, %v65_v9  ;;  %2936 = vmatmul.mubr.msk.bf16.vlgmr.msra.gmra.mrb[0].mxu1 %vm103_vm0, %v73_v17  ;;  %v3346_v36 = vld [vmem:[#allocation2 + $0x10] sm:$0xff]   ;;  %v44_v37 = vld [vmem:[%s4060_s0 + $0x60] sm:$0xff]  ;;  %v45_v38 = vld [vmem:[%s4060_s0 + $0x68] sm:$0xff]  ;;  %v69_v44 = vpack.c.bf16 %v43_v35, %v42_v34 }
  0x1c   :  { %2923 = vmatprep.mubr.msk.bf16.mxu0 %vm103_vm0, %v66_v10  ;;  %2939 = vmatprep.mubr.msk.bf16.mxu1 %vm103_vm0, %v74_v22  ;;  %v58_v39 = vld [vmem:[%s4060_s0 + $0xd0] sm:$0xff]  ;;  %v59_v40 = vld [vmem:[%s4060_s0 + $0xd8] sm:$0xff]  ;;  %v60_v41 = vld [vmem:[%s4060_s0 + $0xe0] sm:$0xff]  ;;  %v70_v45 = vpack.c.bf16 %v45_v38, %v44_v37 }
  0x1d   :  { %2951 = vmatprep.subr.bf16.mxu1 %v3344_v28  ;;  %v61_v42 = vld [vmem:[%s4060_s0 + $0xe8] sm:$0xff]  ;;  %v3347_v43 = vld [vmem:[#allocation2 + $0x18] sm:$0xff]   ;;  %v77_v46 = vpack.c.bf16 %v59_v40, %v58_v39  ;;  %v3348_v47 = vld [vmem:[#allocation2 + $0x20] sm:$0xff]  }
  0x1e   :  { %2952 = vmatpush3.bf16.msra.mxu1 %v3344_v28  ;;  %v78_v48 = vpack.c.bf16 %v61_v42, %v60_v41  ;;  %v46_v49 = vld [vmem:[%s4060_s0 + $0x70] sm:$0xff]  ;;  %v47_v50 = vld [vmem:[%s4060_s0 + $0x78] sm:$0xff]  ;;  %v3349_v53 = vld [vmem:[#allocation2 + $0x28] sm:$0xff]  }
  0x1f   :  { %2953 = vmatprep.subr.bf16.mxu1 %v3345_v30  ;;  %v62_v51 = vld [vmem:[%s4060_s0 + $0xf0] sm:$0xff]  ;;  %v63_v52 = vld [vmem:[%s4060_s0 + $0xf8] sm:$0xff]  ;;  %v71_v54 = vpack.c.bf16 %v47_v50, %v46_v49  ;;  %v3352_v58 = vld [vmem:[#allocation2 + $0x40] sm:$0xff]  }
  0x20   :  { %v79_v55 = vpack.c.bf16 %v63_v52, %v62_v51  ;;  %v3350_v56 = vld [vmem:[#allocation2 + $0x30] sm:$0xff]   ;;  %v3351_v57 = vld [vmem:[#allocation2 + $0x38] sm:$0xff]   ;;  %v3353_v59 = vld [vmem:[#allocation2 + $0x48] sm:$0xff]   ;;  %2999 = vmatprep.subr.bf16.mxu0 %v3352_v58 }
  0x21   :  { %3000 = vmatpush3.bf16.msra.mxu0 %v3352_v58  ;;  %v3354_v60 = vld [vmem:[#allocation2 + $0x50] sm:$0xff]   ;;  %v3355_v61 = vld [vmem:[#allocation2 + $0x58] sm:$0xff]   ;;  %v3356_v62 = vld [vmem:[#allocation2 + $0x60] sm:$0xff]  }
  0x22   :  { %2954 = vmatpush3.bf16.msra.mxu1 %v3345_v30  ;;  %3001 = vmatprep.subr.bf16.mxu0 %v3353_v59  ;;  %v3357_v63 = vld [vmem:[#allocation2 + $0x68] sm:$0xff]   ;;  %v3593_v0 = vld [vmem:[%s4063_s3] ss:$0 sm:$0xff] }
  0x23   :  { %2924 = vmatmul.mubr.msk.bf16.gmra.mrb[4].mxu0 %vm103_vm0, %v67_v29  ;;  %2940 = vmatmul.mubr.msk.bf16.gmra.mrb[4].mxu1 %vm103_vm0, %v75_v32 }
  0x24   :  { %2927 = vmatprep.mubr.msk.bf16.mxu0 %vm103_vm0, %v68_v31  ;;  %2943 = vmatprep.mubr.msk.bf16.mxu1 %vm103_vm0, %v76_v33 }
  0x25   :  { %2955 = vmatprep.subr.bf16.mxu1 %v3346_v36  ;;  %3002 = vmatpush3.bf16.msra.mxu0 %v3353_v59 }
  0x26   :  { %2956 = vmatpush3.bf16.msra.mxu1 %v3346_v36  ;;  %3003 = vmatprep.subr.bf16.mxu0 %v3354_v60 }
  0x27   :  { %2957 = vmatprep.subr.bf16.mxu1 %v3347_v43 }
  0x29   :  { %3004 = vmatpush3.bf16.msra.mxu0 %v3354_v60 }
  0x2a   :  { %2958 = vmatpush3.bf16.msra.mxu1 %v3347_v43  ;;  %3005 = vmatprep.subr.bf16.mxu0 %v3355_v61 }
  0x2b   :  { %2928 = vmatmul.mubr.msk.bf16.gmra.mrb[8].mxu0 %vm103_vm0, %v69_v44  ;;  %2944 = vmatmul.mubr.msk.bf16.gmra.mrb[8].mxu1 %vm103_vm0, %v77_v46 }
  0x2c   :  { %2931 = vmatprep.mubr.msk.bf16.mxu0 %vm103_vm0, %v70_v45  ;;  %2947 = vmatprep.mubr.msk.bf16.mxu1 %vm103_vm0, %v78_v48 }
  0x2d   :  { %2959 = vmatprep.subr.bf16.mxu1 %v3348_v47  ;;  %3006 = vmatpush3.bf16.msra.mxu0 %v3355_v61 }
  0x2e   :  { %2960 = vmatpush3.bf16.msra.mxu1 %v3348_v47  ;;  %3007 = vmatprep.subr.bf16.mxu0 %v3356_v62 }
  0x2f   :  { %2961 = vmatprep.subr.bf16.mxu1 %v3349_v53 }
  0x31   :  { %3008 = vmatpush3.bf16.msra.mxu0 %v3356_v62 }
  0x32   :  { %2962 = vmatpush3.bf16.msra.mxu1 %v3349_v53  ;;  %3009 = vmatprep.subr.bf16.mxu0 %v3357_v63 }
  0x33   :  { %2932 = vmatmul.mubr.msk.bf16.gmra.mrb[12].mxu0 %vm103_vm0, %v71_v54  ;;  %2948 = vmatmul.mubr.msk.bf16.gmra.mrb[12].mxu1 %vm103_vm0, %v79_v55 }
  0x34   :  { %2963 = vmatprep.subr.bf16.mxu1 %v3350_v56 }
  0x35   :  { %3010 = vmatpush3.bf16.msra.mxu0 %v3357_v63 }
  0x36   :  { %2964 = vmatpush3.bf16.msra.mxu1 %v3350_v56 }
  0x37   :  { %2965 = vmatprep.subr.bf16.mxu1 %v3351_v57 }
  0x3a   :  { %2966 = vmatpush3.bf16.msra.mxu1 %v3351_v57 }
  0xee   :  { %v2921_v1 = vpop.f32.mrb[0].mxu0  ;;  %v2937_v4 = vpop.f32.mrb[0].mxu1 }
  0xef   :  { %v195_v2 = vadd.f32 %v2921_v1, %v3593_v0  ;;  %v186_v3 = vpop.f32.mrb[1].mxu0  ;;  %v259_v7 = vadd.f32 %v2937_v4, %v3593_v0  ;;  %v250_v8 = vpop.f32.mrb[1].mxu1 }
  0xf0   :  { %v187_v5 = vadd.f32 %v3593_v0, %v186_v3  ;;  %v2922_v6 = vpop.f32.mrb[2].mxu0  ;;  %v251_v11 = vadd.f32 %v3593_v0, %v250_v8  ;;  %v2938_v12 = vpop.f32.mrb[2].mxu1 }
  0xf1   :  { %v198_v9 = vadd.f32 %v2922_v6, %v3593_v0  ;;  %v189_v10 = vpop.f32.mrb[3].mxu0  ;;  %v331_v14 = vmax.f32 %v259_v7, 0.0  ;;  %v262_v15 = vadd.f32 %v2938_v12, %v3593_v0  ;;  %v253_v16 = vpop.f32.mrb[3].mxu1  ;;  %v315_v17 = vmax.f32 %v195_v2, 0.0 }
  0xf2   :  { %v190_v13 = vadd.f32 %v3593_v0, %v189_v10  ;;  %v329_v19 = vmax.f32 %v251_v11, 0.0  ;;  %v254_v20 = vadd.f32 %v3593_v0, %v253_v16  ;;  %v313_v21 = vmax.f32 %v187_v5, 0.0 }
  0xf3   :  { %v316_v18 = vmax.f32 %v198_v9, 0.0  ;;  %v332_v23 = vmax.f32 %v262_v15, 0.0 }
  0xf4   :  { %v314_v22 = vmax.f32 %v190_v13, 0.0  ;;  %v330_v25 = vmax.f32 %v254_v20, 0.0 }
  0xf5   :  { %v346_v24 = vpack.c.bf16 %v316_v18, %v315_v17  ;;  %v3603_v28 = vpack.c.bf16 %v332_v23, %v331_v14 }
  0xf6   :  { %v345_v26 = vpack.c.bf16 %v314_v22, %v313_v21  ;;  %v2925_v27 = vpop.f32.mrb[4].mxu0  ;;  %v3606_v31 = vpack.c.bf16 %v330_v25, %v329_v19  ;;  %v2941_v32 = vpop.f32.mrb[4].mxu1 }
  0xf7   :  { %v211_v29 = vadd.f32 %v2925_v27, %v3593_v0  ;;  %v202_v30 = vpop.f32.mrb[5].mxu0  ;;  %v275_v35 = vadd.f32 %v2941_v32, %v3593_v0  ;;  %v266_v36 = vpop.f32.mrb[5].mxu1 }
  0xf8   :  { %v203_v33 = vadd.f32 %v3593_v0, %v202_v30  ;;  %v2926_v34 = vpop.f32.mrb[6].mxu0  ;;  %2967 = vmatprep.mubr.bf16.mxu1 %v345_v26  ;;  %v267_v39 = vadd.f32 %v3593_v0, %v266_v36  ;;  %v2942_v40 = vpop.f32.mrb[6].mxu1 }
  0xf9   :  { %v214_v37 = vadd.f32 %v2926_v34, %v3593_v0  ;;  %v205_v38 = vpop.f32.mrb[7].mxu0  ;;  %2968 = vmatmul.mubr.bf16.vlgmr.msra.gmra.mrb[16].mxu1 %v346_v24  ;;  %v335_v42 = vmax.f32 %v275_v35, 0.0  ;;  %v278_v43 = vadd.f32 %v2942_v40, %v3593_v0  ;;  %v269_v44 = vpop.f32.mrb[7].mxu1  ;;  %v319_v45 = vmax.f32 %v211_v29, 0.0 }
  0xfa   :  { %v206_v41 = vadd.f32 %v3593_v0, %v205_v38  ;;  %v333_v47 = vmax.f32 %v267_v39, 0.0  ;;  %v270_v48 = vadd.f32 %v3593_v0, %v269_v44  ;;  %v317_v49 = vmax.f32 %v203_v33, 0.0 }
  0xfb   :  { %v320_v46 = vmax.f32 %v214_v37, 0.0  ;;  %v336_v51 = vmax.f32 %v278_v43, 0.0 }
  0xfc   :  { %v318_v50 = vmax.f32 %v206_v41, 0.0  ;;  %v334_v53 = vmax.f32 %v270_v48, 0.0 }
  0xfd   :  { %v348_v52 = vpack.c.bf16 %v320_v46, %v319_v45  ;;  %v3615_v56 = vpack.c.bf16 %v336_v51, %v335_v42 }
  0xfe   :  { %v347_v54 = vpack.c.bf16 %v318_v50, %v317_v49  ;;  %v2929_v55 = vpop.f32.mrb[8].mxu0  ;;  %v355_v59 = vpack.c.bf16 %v334_v53, %v333_v47  ;;  %v2945_v60 = vpop.f32.mrb[8].mxu1  ;;  %v3360_v53 = vld [vmem:[#allocation2 + $0x80] sm:$0xff]  }
  0xff   :  { %v227_v57 = vadd.f32 %v2929_v55, %v3593_v0  ;;  %v218_v58 = vpop.f32.mrb[9].mxu0  ;;  %v291_v63 = vadd.f32 %v2945_v60, %v3593_v0  ;;  %v282_v1 = vpop.f32.mrb[9].mxu1  ;;  %3047 = vmatprep.subr.bf16.mxu1 %v3360_v53  ;;  %v3364_v55 = vld [vmem:[#allocation2 + $0xa0] sm:$0xff]  }
 0x100   :  { %v219_v61 = vadd.f32 %v3593_v0, %v218_v58  ;;  %v2930_v62 = vpop.f32.mrb[10].mxu0  ;;  %2971 = vmatprep.mubr.bf16.mxu1 %v347_v54  ;;  %v283_v4 = vadd.f32 %v3593_v0, %v282_v1  ;;  %v2946_v5 = vpop.f32.mrb[10].mxu1  ;;  %v3361_v54 = vld [vmem:[#allocation2 + $0x88] sm:$0xff]   ;;  %3048 = vmatpush3.bf16.msra.mxu1 %v3360_v53  ;;  %v3639_v58 = vld [vmem:[%s4063_s3 + $0x1] ss:$0 sm:$0xff] }
 0x101   :  { %v230_v2 = vadd.f32 %v2930_v62, %v3593_v0  ;;  %v221_v3 = vpop.f32.mrb[11].mxu0  ;;  %2972 = vmatmul.mubr.bf16.gmra.mrb[20].mxu1 %v348_v52  ;;  %v339_v7 = vmax.f32 %v291_v63, 0.0  ;;  %v294_v8 = vadd.f32 %v2946_v5, %v3593_v0  ;;  %v285_v9 = vpop.f32.mrb[11].mxu1  ;;  %v323_v10 = vmax.f32 %v227_v57, 0.0  ;;  %v3359_v52 = vld [vmem:[#allocation2 + $0x78] sm:$0xff]   ;;  %3049 = vmatprep.subr.bf16.mxu1 %v3361_v54  ;;  %v3366_v57 = vld [vmem:[#allocation2 + $0xb0] sm:$0xff]  }
 0x102   :  { %v222_v6 = vadd.f32 %v3593_v0, %v221_v3  ;;  %v337_v12 = vmax.f32 %v283_v4, 0.0  ;;  %v286_v13 = vadd.f32 %v3593_v0, %v285_v9  ;;  %v321_v14 = vmax.f32 %v219_v61, 0.0 }
 0x103   :  { %v324_v11 = vmax.f32 %v230_v2, 0.0  ;;  %v340_v16 = vmax.f32 %v294_v8, 0.0 }
 0x104   :  { %v322_v15 = vmax.f32 %v222_v6, 0.0  ;;  %v338_v18 = vmax.f32 %v286_v13, 0.0  ;;  %3050 = vmatpush3.bf16.msra.mxu1 %v3361_v54 }
 0x105   :  { %v350_v17 = vpack.c.bf16 %v324_v11, %v323_v10  ;;  %v358_v21 = vpack.c.bf16 %v340_v16, %v339_v7 }
 0x106   :  { %v349_v19 = vpack.c.bf16 %v322_v15, %v321_v14  ;;  %v2933_v20 = vpop.f32.mrb[12].mxu0  ;;  %v357_v24 = vpack.c.bf16 %v338_v18, %v337_v12  ;;  %v2949_v25 = vpop.f32.mrb[12].mxu1 }
 0x107   :  { %v243_v22 = vadd.f32 %v2933_v20, %v3593_v0  ;;  %v234_v23 = vpop.f32.mrb[13].mxu0  ;;  %v307_v29 = vadd.f32 %v2949_v25, %v3593_v0  ;;  %v298_v30 = vpop.f32.mrb[13].mxu1 }
 0x108   :  { %v235_v26 = vadd.f32 %v3593_v0, %v234_v23  ;;  %v2934_v27 = vpop.f32.mrb[14].mxu0  ;;  %2975 = vmatprep.mubr.bf16.mxu1 %v349_v19  ;;  %v299_v34 = vadd.f32 %v3593_v0, %v298_v30  ;;  %v2950_v35 = vpop.f32.mrb[14].mxu1 }
 0x109   :  { %v246_v32 = vadd.f32 %v2934_v27, %v3593_v0  ;;  %v237_v33 = vpop.f32.mrb[15].mxu0  ;;  %2976 = vmatmul.mubr.bf16.gmra.mrb[24].mxu1 %v350_v17  ;;  %v343_v37 = vmax.f32 %v307_v29, 0.0  ;;  %v310_v38 = vadd.f32 %v2950_v35, %v3593_v0  ;;  %v301_v39 = vpop.f32.mrb[15].mxu1  ;;  %v327_v40 = vmax.f32 %v243_v22, 0.0 }
 0x10a   :  { %v238_v36 = vadd.f32 %v3593_v0, %v237_v33  ;;  %v341_v42 = vmax.f32 %v299_v34, 0.0  ;;  %v302_v43 = vadd.f32 %v3593_v0, %v301_v39  ;;  %v325_v44 = vmax.f32 %v235_v26, 0.0  ;;  %v3358_v0 = vld [vmem:[#allocation2 + $0x70] sm:$0xff]  }
 0x10b   :  { %v328_v41 = vmax.f32 %v246_v32, 0.0  ;;  %v344_v46 = vmax.f32 %v310_v38, 0.0  ;;  %3011 = vmatprep.subr.bf16.mxu0 %v3358_v0 }
 0x10c   :  { %v326_v45 = vmax.f32 %v238_v36, 0.0  ;;  %v342_v48 = vmax.f32 %v302_v43, 0.0  ;;  %3012 = vmatpush3.bf16.msra.mxu0 %v3358_v0 }
 0x10d   :  { %v352_v47 = vpack.c.bf16 %v328_v41, %v327_v40  ;;  %v360_v50 = vpack.c.bf16 %v344_v46, %v343_v37  ;;  %3013 = vmatprep.subr.bf16.mxu0 %v3359_v52 }
 0x10e   :  { %v351_v49 = vpack.c.bf16 %v326_v45, %v325_v44  ;;  %v359_v51 = vpack.c.bf16 %v342_v48, %v341_v42 }
 0x110   :  { %2979 = vmatprep.mubr.bf16.mxu1 %v351_v49  ;;  %3014 = vmatpush3.bf16.msra.mxu0 %v3359_v52 }
 0x111   :  { %2980 = vmatmul.mubr.bf16.gmra.mrb[28].mxu1 %v352_v47 }
 0x112   :  { %2983 = vmatprep.mubr.bf16.mxu1 %v3606_v31  ;;  %v3362_v31 = vld [vmem:[#allocation2 + $0x90] sm:$0xff]  }
 0x113   :  { %3051 = vmatprep.subr.bf16.mxu1 %v3362_v31 }
 0x114   :  { %3052 = vmatpush3.bf16.msra.mxu1 %v3362_v31 }
 0x119   :  { %2984 = vmatmul.mubr.bf16.gmra.mrb[32].mxu1 %v3603_v28  ;;  %v3363_v28 = vld [vmem:[#allocation2 + $0x98] sm:$0xff]  }
 0x11a   :  { %2987 = vmatprep.mubr.bf16.mxu1 %v355_v59  ;;  %3053 = vmatprep.subr.bf16.mxu1 %v3363_v28 }
 0x11b   :  { %3054 = vmatpush3.bf16.msra.mxu1 %v3363_v28 }
 0x11c   :  { %3055 = vmatprep.subr.bf16.mxu1 %v3364_v55 }
 0x11f   :  { %3056 = vmatpush3.bf16.msra.mxu1 %v3364_v55 }
 0x121   :  { %2988 = vmatmul.mubr.bf16.gmra.mrb[36].mxu1 %v3615_v56  ;;  %v3365_v56 = vld [vmem:[#allocation2 + $0xa8] sm:$0xff]  }
 0x122   :  { %2991 = vmatprep.mubr.bf16.mxu1 %v357_v24  ;;  %3057 = vmatprep.subr.bf16.mxu1 %v3365_v56 }
 0x123   :  { %3058 = vmatpush3.bf16.msra.mxu1 %v3365_v56 }
 0x124   :  { %3059 = vmatprep.subr.bf16.mxu1 %v3366_v57 }
 0x127   :  { %3060 = vmatpush3.bf16.msra.mxu1 %v3366_v57 }
 0x129   :  { %2992 = vmatmul.mubr.bf16.gmra.mrb[40].mxu1 %v358_v21 }
 0x12a   :  { %2995 = vmatprep.mubr.bf16.mxu1 %v359_v51 }
 0x131   :  { %2996 = vmatmul.mubr.bf16.gmra.mrb[44].mxu1 %v360_v50 }
 0x1cc   :  { %v2969_v59 = vpop.f32.mrb[16].mxu1 }
 0x1cd   :  { %v476_v60 = vadd.f32 %v2969_v59, %v3639_v58  ;;  %v467_v61 = vpop.f32.mrb[17].mxu1 }
 0x1ce   :  { %v468_v62 = vadd.f32 %v3639_v58, %v467_v61  ;;  %v2970_v63 = vpop.f32.mrb[18].mxu1 }
 0x1cf   :  { %v479_v1 = vadd.f32 %v2970_v63, %v3639_v58  ;;  %v470_v2 = vpop.f32.mrb[19].mxu1  ;;  %v596_v4 = vmax.f32 %v476_v60, 0.0 }
 0x1d0   :  { %v471_v3 = vadd.f32 %v3639_v58, %v470_v2  ;;  %v594_v6 = vmax.f32 %v468_v62, 0.0 }
 0x1d1   :  { %v597_v5 = vmax.f32 %v479_v1, 0.0 }
 0x1d2   :  { %v595_v7 = vmax.f32 %v471_v3, 0.0 }
 0x1d3   :  { %v627_v8 = vpack.c.bf16 %v597_v5, %v596_v4 }
 0x1d4   :  { %v626_v9 = vpack.c.bf16 %v595_v7, %v594_v6  ;;  %v2973_v10 = vpop.f32.mrb[20].mxu1 }
 0x1d5   :  { %v492_v11 = vadd.f32 %v2973_v10, %v3639_v58  ;;  %v483_v12 = vpop.f32.mrb[21].mxu1 }
 0x1d6   :  { %v484_v13 = vadd.f32 %v3639_v58, %v483_v12  ;;  %v2974_v14 = vpop.f32.mrb[22].mxu1  ;;  %3015 = vmatprep.mubr.bf16.mxu0 %v626_v9 }
 0x1d7   :  { %v495_v15 = vadd.f32 %v2974_v14, %v3639_v58  ;;  %v486_v16 = vpop.f32.mrb[23].mxu1  ;;  %3016 = vmatmul.mubr.bf16.vlgmr.msra.gmra.mrb[16].mxu0 %v627_v8  ;;  %v600_v18 = vmax.f32 %v492_v11, 0.0 }
 0x1d8   :  { %v487_v17 = vadd.f32 %v3639_v58, %v486_v16  ;;  %v598_v20 = vmax.f32 %v484_v13, 0.0 }
 0x1d9   :  { %v601_v19 = vmax.f32 %v495_v15, 0.0 }
 0x1da   :  { %v599_v21 = vmax.f32 %v487_v17, 0.0 }
 0x1db   :  { %v629_v22 = vpack.c.bf16 %v601_v19, %v600_v18 }
 0x1dc   :  { %v628_v23 = vpack.c.bf16 %v599_v21, %v598_v20  ;;  %v2977_v24 = vpop.f32.mrb[24].mxu1 }
 0x1dd   :  { %v508_v25 = vadd.f32 %v2977_v24, %v3639_v58  ;;  %v499_v26 = vpop.f32.mrb[25].mxu1 }
 0x1de   :  { %v500_v27 = vadd.f32 %v3639_v58, %v499_v26  ;;  %v2978_v29 = vpop.f32.mrb[26].mxu1  ;;  %3019 = vmatprep.mubr.bf16.mxu0 %v628_v23 }
 0x1df   :  { %v511_v30 = vadd.f32 %v2978_v29, %v3639_v58  ;;  %v502_v32 = vpop.f32.mrb[27].mxu1  ;;  %3020 = vmatmul.mubr.bf16.gmra.mrb[20].mxu0 %v629_v22  ;;  %v604_v34 = vmax.f32 %v508_v25, 0.0 }
 0x1e0   :  { %v503_v33 = vadd.f32 %v3639_v58, %v502_v32  ;;  %v602_v36 = vmax.f32 %v500_v27, 0.0 }
 0x1e1   :  { %v605_v35 = vmax.f32 %v511_v30, 0.0 }
 0x1e2   :  { %v603_v37 = vmax.f32 %v503_v33, 0.0 }
 0x1e3   :  { %v631_v38 = vpack.c.bf16 %v605_v35, %v604_v34 }
 0x1e4   :  { %v630_v39 = vpack.c.bf16 %v603_v37, %v602_v36  ;;  %v2981_v40 = vpop.f32.mrb[28].mxu1 }
 0x1e5   :  { %v524_v41 = vadd.f32 %v2981_v40, %v3639_v58  ;;  %v515_v42 = vpop.f32.mrb[29].mxu1 }
 0x1e6   :  { %v516_v43 = vadd.f32 %v3639_v58, %v515_v42  ;;  %v2982_v44 = vpop.f32.mrb[30].mxu1  ;;  %3023 = vmatprep.mubr.bf16.mxu0 %v630_v39 }
 0x1e7   :  { %v527_v45 = vadd.f32 %v2982_v44, %v3639_v58  ;;  %v518_v46 = vpop.f32.mrb[31].mxu1  ;;  %3024 = vmatmul.mubr.bf16.gmra.mrb[24].mxu0 %v631_v38  ;;  %v608_v48 = vmax.f32 %v524_v41, 0.0 }
 0x1e8   :  { %v519_v47 = vadd.f32 %v3639_v58, %v518_v46  ;;  %v606_v50 = vmax.f32 %v516_v43, 0.0 }
 0x1e9   :  { %v609_v49 = vmax.f32 %v527_v45, 0.0 }
 0x1ea   :  { %v607_v51 = vmax.f32 %v519_v47, 0.0  ;;  %v3367_v47 = vld [vmem:[#allocation2 + $0xb8] sm:$0xff]  }
 0x1eb   :  { %v633_v0 = vpack.c.bf16 %v609_v49, %v608_v48  ;;  %3061 = vmatprep.subr.bf16.mxu1 %v3367_v47  ;;  %v3368_v48 = vld [vmem:[#allocation2 + $0xc0] sm:$0xff]   ;;  %v3369_v49 = vld [vmem:[#allocation2 + $0xc8] sm:$0xff]  }
 0x1ec   :  { %v632_v52 = vpack.c.bf16 %v607_v51, %v606_v50  ;;  %v2985_v53 = vpop.f32.mrb[32].mxu1  ;;  %3062 = vmatpush3.bf16.msra.mxu1 %v3367_v47  ;;  %3095 = vmatprep.subr.bf16.mxu0 %v3368_v48  ;;  %v3370_v50 = vld [vmem:[#allocation2 + $0xd0] sm:$0xff]   ;;  %v3372_v51 = vld [vmem:[#allocation2 + $0xe0] sm:$0xff]  }
 0x1ed   :  { %v540_v54 = vadd.f32 %v2985_v53, %v3639_v58  ;;  %v531_v31 = vpop.f32.mrb[33].mxu1  ;;  %3096 = vmatpush3.bf16.msra.mxu0 %v3368_v48  ;;  %v3676_v53 = vld [vmem:[%s4063_s3 + $0x2] ss:$0 sm:$0xff] }
 0x1ee   :  { %v532_v28 = vadd.f32 %v3639_v58, %v531_v31  ;;  %v2986_v55 = vpop.f32.mrb[34].mxu1  ;;  %3027 = vmatprep.mubr.bf16.mxu0 %v632_v52  ;;  %3097 = vmatprep.subr.bf16.mxu0 %v3369_v49  ;;  %v3374_v52 = vld [vmem:[#allocation2 + $0xf0] sm:$0xff]  }
 0x1ef   :  { %v543_v56 = vadd.f32 %v2986_v55, %v3639_v58  ;;  %v534_v57 = vpop.f32.mrb[35].mxu1  ;;  %3028 = vmatmul.mubr.bf16.gmra.mrb[28].mxu0 %v633_v0  ;;  %v612_v60 = vmax.f32 %v540_v54, 0.0  ;;  %v3373_v0 = vld [vmem:[#allocation2 + $0xe8] sm:$0xff]  }
 0x1f0   :  { %v535_v59 = vadd.f32 %v3639_v58, %v534_v57  ;;  %v610_v62 = vmax.f32 %v532_v28, 0.0 }
 0x1f1   :  { %v613_v61 = vmax.f32 %v543_v56, 0.0  ;;  %3098 = vmatpush3.bf16.msra.mxu0 %v3369_v49 }
 0x1f2   :  { %v611_v63 = vmax.f32 %v535_v59, 0.0  ;;  %3099 = vmatprep.subr.bf16.mxu0 %v3370_v50 }
 0x1f3   :  { %v635_v1 = vpack.c.bf16 %v613_v61, %v612_v60 }
 0x1f4   :  { %v634_v2 = vpack.c.bf16 %v611_v63, %v610_v62  ;;  %v2989_v3 = vpop.f32.mrb[36].mxu1 }
 0x1f5   :  { %v556_v4 = vadd.f32 %v2989_v3, %v3639_v58  ;;  %v547_v5 = vpop.f32.mrb[37].mxu1  ;;  %3100 = vmatpush3.bf16.msra.mxu0 %v3370_v50 }
 0x1f6   :  { %v548_v6 = vadd.f32 %v3639_v58, %v547_v5  ;;  %v2990_v7 = vpop.f32.mrb[38].mxu1  ;;  %3031 = vmatprep.mubr.bf16.mxu0 %v634_v2 }
 0x1f7   :  { %v559_v8 = vadd.f32 %v2990_v7, %v3639_v58  ;;  %v550_v9 = vpop.f32.mrb[39].mxu1  ;;  %3032 = vmatmul.mubr.bf16.gmra.mrb[32].mxu0 %v635_v1  ;;  %v616_v11 = vmax.f32 %v556_v4, 0.0 }
 0x1f8   :  { %v551_v10 = vadd.f32 %v3639_v58, %v550_v9  ;;  %v614_v13 = vmax.f32 %v548_v6, 0.0 }
 0x1f9   :  { %v617_v12 = vmax.f32 %v559_v8, 0.0 }
 0x1fa   :  { %v615_v14 = vmax.f32 %v551_v10, 0.0 }
 0x1fb   :  { %v637_v15 = vpack.c.bf16 %v617_v12, %v616_v11 }
 0x1fc   :  { %v636_v16 = vpack.c.bf16 %v615_v14, %v614_v13  ;;  %v2993_v17 = vpop.f32.mrb[40].mxu1 }
 0x1fd   :  { %v572_v18 = vadd.f32 %v2993_v17, %v3639_v58  ;;  %v563_v19 = vpop.f32.mrb[41].mxu1 }
 0x1fe   :  { %v564_v20 = vadd.f32 %v3639_v58, %v563_v19  ;;  %v2994_v21 = vpop.f32.mrb[42].mxu1  ;;  %3035 = vmatprep.mubr.bf16.mxu0 %v636_v16 }
 0x1ff   :  { %v575_v22 = vadd.f32 %v2994_v21, %v3639_v58  ;;  %v566_v23 = vpop.f32.mrb[43].mxu1  ;;  %3036 = vmatmul.mubr.bf16.gmra.mrb[36].mxu0 %v637_v15  ;;  %v620_v25 = vmax.f32 %v572_v18, 0.0 }
 0x200   :  { %v567_v24 = vadd.f32 %v3639_v58, %v566_v23  ;;  %v618_v27 = vmax.f32 %v564_v20, 0.0 }
 0x201   :  { %v621_v26 = vmax.f32 %v575_v22, 0.0 }
 0x202   :  { %v619_v29 = vmax.f32 %v567_v24, 0.0 }
 0x203   :  { %v639_v30 = vpack.c.bf16 %v621_v26, %v620_v25 }
 0x204   :  { %v638_v32 = vpack.c.bf16 %v619_v29, %v618_v27  ;;  %v2997_v33 = vpop.f32.mrb[44].mxu1 }
 0x205   :  { %v588_v34 = vadd.f32 %v2997_v33, %v3639_v58  ;;  %v579_v35 = vpop.f32.mrb[45].mxu1 }
 0x206   :  { %v580_v36 = vadd.f32 %v3639_v58, %v579_v35  ;;  %v2998_v37 = vpop.f32.mrb[46].mxu1  ;;  %3039 = vmatprep.mubr.bf16.mxu0 %v638_v32 }
 0x207   :  { %v591_v38 = vadd.f32 %v2998_v37, %v3639_v58  ;;  %v582_v39 = vpop.f32.mrb[47].mxu1  ;;  %3040 = vmatmul.mubr.bf16.gmra.mrb[40].mxu0 %v639_v30  ;;  %v624_v41 = vmax.f32 %v588_v34, 0.0 }
 0x208   :  { %v583_v40 = vadd.f32 %v3639_v58, %v582_v39  ;;  %v622_v43 = vmax.f32 %v580_v36, 0.0  ;;  %v3371_v58 = vld [vmem:[#allocation2 + $0xd8] sm:$0xff]  }
 0x209   :  { %v625_v42 = vmax.f32 %v591_v38, 0.0  ;;  %3101 = vmatprep.subr.bf16.mxu0 %v3371_v58 }
 0x20a   :  { %v623_v44 = vmax.f32 %v583_v40, 0.0  ;;  %3102 = vmatpush3.bf16.msra.mxu0 %v3371_v58 }
 0x20b   :  { %v641_v45 = vpack.c.bf16 %v625_v42, %v624_v41  ;;  %3103 = vmatprep.subr.bf16.mxu0 %v3372_v51 }
 0x20c   :  { %v640_v46 = vpack.c.bf16 %v623_v44, %v622_v43 }
 0x20e   :  { %3043 = vmatprep.mubr.bf16.mxu0 %v640_v46  ;;  %3104 = vmatpush3.bf16.msra.mxu0 %v3372_v51 }
 0x20f   :  { %3044 = vmatmul.mubr.bf16.gmra.mrb[44].mxu0 %v641_v45  ;;  %3105 = vmatprep.subr.bf16.mxu0 %v3373_v0 }
 0x212   :  { %3106 = vmatpush3.bf16.msra.mxu0 %v3373_v0 }
 0x213   :  { %3107 = vmatprep.subr.bf16.mxu0 %v3374_v52 }
 0x216   :  { %3108 = vmatpush3.bf16.msra.mxu0 %v3374_v52 }
 0x2aa   :  { %v3017_v54 = vpop.f32.mrb[16].mxu0 }
 0x2ab   :  { %v758_v31 = vadd.f32 %v3017_v54, %v3676_v53  ;;  %v749_v28 = vpop.f32.mrb[17].mxu0 }
 0x2ac   :  { %v750_v55 = vadd.f32 %v3676_v53, %v749_v28  ;;  %v3018_v56 = vpop.f32.mrb[18].mxu0 }
 0x2ad   :  { %v761_v57 = vadd.f32 %v3018_v56, %v3676_v53  ;;  %v752_v59 = vpop.f32.mrb[19].mxu0  ;;  %v878_v61 = vmax.f32 %v758_v31, 0.0 }
 0x2ae   :  { %v753_v60 = vadd.f32 %v3676_v53, %v752_v59  ;;  %v876_v63 = vmax.f32 %v750_v55, 0.0 }
 0x2af   :  { %v879_v62 = vmax.f32 %v761_v57, 0.0 }
 0x2b0   :  { %v877_v1 = vmax.f32 %v753_v60, 0.0 }
 0x2b1   :  { %v909_v2 = vpack.c.bf16 %v879_v62, %v878_v61 }
 0x2b2   :  { %v908_v3 = vpack.c.bf16 %v877_v1, %v876_v63  ;;  %v3021_v4 = vpop.f32.mrb[20].mxu0 }
 0x2b3   :  { %v774_v5 = vadd.f32 %v3021_v4, %v3676_v53  ;;  %v765_v6 = vpop.f32.mrb[21].mxu0 }
 0x2b4   :  { %v766_v7 = vadd.f32 %v3676_v53, %v765_v6  ;;  %v3022_v8 = vpop.f32.mrb[22].mxu0  ;;  %3063 = vmatprep.mubr.bf16.mxu1 %v908_v3 }
 0x2b5   :  { %v777_v9 = vadd.f32 %v3022_v8, %v3676_v53  ;;  %v768_v10 = vpop.f32.mrb[23].mxu0  ;;  %3064 = vmatmul.mubr.bf16.vlgmr.msra.gmra.mrb[48].mxu1 %v909_v2  ;;  %v882_v12 = vmax.f32 %v774_v5, 0.0 }
 0x2b6   :  { %v769_v11 = vadd.f32 %v3676_v53, %v768_v10  ;;  %v880_v14 = vmax.f32 %v766_v7, 0.0 }
 0x2b7   :  { %v883_v13 = vmax.f32 %v777_v9, 0.0 }
 0x2b8   :  { %v881_v15 = vmax.f32 %v769_v11, 0.0 }
 0x2b9   :  { %v911_v16 = vpack.c.bf16 %v883_v13, %v882_v12 }
 0x2ba   :  { %v910_v17 = vpack.c.bf16 %v881_v15, %v880_v14  ;;  %v3025_v18 = vpop.f32.mrb[24].mxu0 }
 0x2bb   :  { %v790_v19 = vadd.f32 %v3025_v18, %v3676_v53  ;;  %v781_v20 = vpop.f32.mrb[25].mxu0 }
 0x2bc   :  { %v782_v21 = vadd.f32 %v3676_v53, %v781_v20  ;;  %v3026_v22 = vpop.f32.mrb[26].mxu0  ;;  %3067 = vmatprep.mubr.bf16.mxu1 %v910_v17 }
 0x2bd   :  { %v793_v23 = vadd.f32 %v3026_v22, %v3676_v53  ;;  %v784_v24 = vpop.f32.mrb[27].mxu0  ;;  %3068 = vmatmul.mubr.bf16.gmra.mrb[52].mxu1 %v911_v16  ;;  %v886_v26 = vmax.f32 %v790_v19, 0.0 }
 0x2be   :  { %v785_v25 = vadd.f32 %v3676_v53, %v784_v24  ;;  %v884_v29 = vmax.f32 %v782_v21, 0.0 }
 0x2bf   :  { %v887_v27 = vmax.f32 %v793_v23, 0.0 }
 0x2c0   :  { %v885_v30 = vmax.f32 %v785_v25, 0.0 }
 0x2c1   :  { %v913_v32 = vpack.c.bf16 %v887_v27, %v886_v26 }
 0x2c2   :  { %v912_v33 = vpack.c.bf16 %v885_v30, %v884_v29  ;;  %v3029_v34 = vpop.f32.mrb[28].mxu0 }
 0x2c3   :  { %v806_v35 = vadd.f32 %v3029_v34, %v3676_v53  ;;  %v797_v36 = vpop.f32.mrb[29].mxu0 }
 0x2c4   :  { %v798_v37 = vadd.f32 %v3676_v53, %v797_v36  ;;  %v3030_v38 = vpop.f32.mrb[30].mxu0  ;;  %3071 = vmatprep.mubr.bf16.mxu1 %v912_v33 }
 0x2c5   :  { %v809_v39 = vadd.f32 %v3030_v38, %v3676_v53  ;;  %v800_v40 = vpop.f32.mrb[31].mxu0  ;;  %3072 = vmatmul.mubr.bf16.gmra.mrb[56].mxu1 %v913_v32  ;;  %v890_v42 = vmax.f32 %v806_v35, 0.0 }
 0x2c6   :  { %v801_v41 = vadd.f32 %v3676_v53, %v800_v40  ;;  %v888_v44 = vmax.f32 %v798_v37, 0.0 }
 0x2c7   :  { %v891_v43 = vmax.f32 %v809_v39, 0.0 }
 0x2c8   :  { %v889_v45 = vmax.f32 %v801_v41, 0.0  ;;  %v3375_v41 = vld [vmem:[#allocation2 + $0xf8] sm:$0xff]  }
 0x2c9   :  { %v915_v46 = vpack.c.bf16 %v891_v43, %v890_v42  ;;  %3109 = vmatprep.subr.bf16.mxu0 %v3375_v41  ;;  %v3376_v42 = vld [vmem:[#allocation2 + $0x100] sm:$0xff]   ;;  %v3377_v43 = vld [vmem:[#allocation2 + $0x108] sm:$0xff]  }
 0x2ca   :  { %v914_v47 = vpack.c.bf16 %v889_v45, %v888_v44  ;;  %v3033_v48 = vpop.f32.mrb[32].mxu0  ;;  %3110 = vmatpush3.bf16.msra.mxu0 %v3375_v41  ;;  %3143 = vmatprep.subr.bf16.mxu1 %v3376_v42  ;;  %v3378_v44 = vld [vmem:[#allocation2 + $0x110] sm:$0xff]   ;;  %v3380_v45 = vld [vmem:[#allocation2 + $0x120] sm:$0xff]  }
 0x2cb   :  { %v822_v49 = vadd.f32 %v3033_v48, %v3676_v53  ;;  %v813_v50 = vpop.f32.mrb[33].mxu0  ;;  %3144 = vmatpush3.bf16.msra.mxu1 %v3376_v42  ;;  %v3713_v48 = vld [vmem:[%s4063_s3 + $0x3] ss:$0 sm:$0xff] }
 0x2cc   :  { %v814_v58 = vadd.f32 %v3676_v53, %v813_v50  ;;  %v3034_v51 = vpop.f32.mrb[34].mxu0  ;;  %3075 = vmatprep.mubr.bf16.mxu1 %v914_v47  ;;  %3145 = vmatprep.subr.bf16.mxu1 %v3377_v43  ;;  %v3382_v47 = vld [vmem:[#allocation2 + $0x130] sm:$0xff]  }
 0x2cd   :  { %v825_v0 = vadd.f32 %v3034_v51, %v3676_v53  ;;  %v816_v52 = vpop.f32.mrb[35].mxu0  ;;  %3076 = vmatmul.mubr.bf16.gmra.mrb[60].mxu1 %v915_v46  ;;  %v894_v31 = vmax.f32 %v822_v49, 0.0  ;;  %v3381_v46 = vld [vmem:[#allocation2 + $0x128] sm:$0xff]  }
 0x2ce   :  { %v817_v54 = vadd.f32 %v3676_v53, %v816_v52  ;;  %v892_v55 = vmax.f32 %v814_v58, 0.0 }
 0x2cf   :  { %v895_v28 = vmax.f32 %v825_v0, 0.0  ;;  %3146 = vmatpush3.bf16.msra.mxu1 %v3377_v43 }
 0x2d0   :  { %v893_v56 = vmax.f32 %v817_v54, 0.0  ;;  %3147 = vmatprep.subr.bf16.mxu1 %v3378_v44 }
 0x2d1   :  { %v917_v57 = vpack.c.bf16 %v895_v28, %v894_v31 }
 0x2d2   :  { %v916_v59 = vpack.c.bf16 %v893_v56, %v892_v55  ;;  %v3037_v60 = vpop.f32.mrb[36].mxu0 }
 0x2d3   :  { %v838_v61 = vadd.f32 %v3037_v60, %v3676_v53  ;;  %v829_v62 = vpop.f32.mrb[37].mxu0  ;;  %3148 = vmatpush3.bf16.msra.mxu1 %v3378_v44 }
 0x2d4   :  { %v830_v63 = vadd.f32 %v3676_v53, %v829_v62  ;;  %v3038_v1 = vpop.f32.mrb[38].mxu0  ;;  %3079 = vmatprep.mubr.bf16.mxu1 %v916_v59 }
 0x2d5   :  { %v841_v2 = vadd.f32 %v3038_v1, %v3676_v53  ;;  %v832_v3 = vpop.f32.mrb[39].mxu0  ;;  %3080 = vmatmul.mubr.bf16.gmra.mrb[64].mxu1 %v917_v57  ;;  %v898_v5 = vmax.f32 %v838_v61, 0.0 }
 0x2d6   :  { %v833_v4 = vadd.f32 %v3676_v53, %v832_v3  ;;  %v896_v7 = vmax.f32 %v830_v63, 0.0 }
 0x2d7   :  { %v899_v6 = vmax.f32 %v841_v2, 0.0 }
 0x2d8   :  { %v897_v8 = vmax.f32 %v833_v4, 0.0 }
 0x2d9   :  { %v919_v9 = vpack.c.bf16 %v899_v6, %v898_v5 }
 0x2da   :  { %v918_v10 = vpack.c.bf16 %v897_v8, %v896_v7  ;;  %v3041_v11 = vpop.f32.mrb[40].mxu0 }
 0x2db   :  { %v854_v12 = vadd.f32 %v3041_v11, %v3676_v53  ;;  %v845_v13 = vpop.f32.mrb[41].mxu0 }
 0x2dc   :  { %v846_v14 = vadd.f32 %v3676_v53, %v845_v13  ;;  %v3042_v15 = vpop.f32.mrb[42].mxu0  ;;  %3083 = vmatprep.mubr.bf16.mxu1 %v918_v10 }
 0x2dd   :  { %v857_v16 = vadd.f32 %v3042_v15, %v3676_v53  ;;  %v848_v17 = vpop.f32.mrb[43].mxu0  ;;  %3084 = vmatmul.mubr.bf16.gmra.mrb[68].mxu1 %v919_v9  ;;  %v902_v19 = vmax.f32 %v854_v12, 0.0 }
 0x2de   :  { %v849_v18 = vadd.f32 %v3676_v53, %v848_v17  ;;  %v900_v21 = vmax.f32 %v846_v14, 0.0 }
 0x2df   :  { %v903_v20 = vmax.f32 %v857_v16, 0.0 }
 0x2e0   :  { %v901_v22 = vmax.f32 %v849_v18, 0.0 }
 0x2e1   :  { %v921_v23 = vpack.c.bf16 %v903_v20, %v902_v19 }
 0x2e2   :  { %v920_v24 = vpack.c.bf16 %v901_v22, %v900_v21  ;;  %v3045_v25 = vpop.f32.mrb[44].mxu0 }
 0x2e3   :  { %v870_v26 = vadd.f32 %v3045_v25, %v3676_v53  ;;  %v861_v27 = vpop.f32.mrb[45].mxu0 }
 0x2e4   :  { %v862_v29 = vadd.f32 %v3676_v53, %v861_v27  ;;  %v3046_v30 = vpop.f32.mrb[46].mxu0  ;;  %3087 = vmatprep.mubr.bf16.mxu1 %v920_v24 }
 0x2e5   :  { %v873_v32 = vadd.f32 %v3046_v30, %v3676_v53  ;;  %v864_v33 = vpop.f32.mrb[47].mxu0  ;;  %3088 = vmatmul.mubr.bf16.gmra.mrb[72].mxu1 %v921_v23  ;;  %v906_v35 = vmax.f32 %v870_v26, 0.0 }
 0x2e6   :  { %v865_v34 = vadd.f32 %v3676_v53, %v864_v33  ;;  %v904_v37 = vmax.f32 %v862_v29, 0.0  ;;  %v3379_v53 = vld [vmem:[#allocation2 + $0x118] sm:$0xff]  }
 0x2e7   :  { %v907_v36 = vmax.f32 %v873_v32, 0.0  ;;  %3149 = vmatprep.subr.bf16.mxu1 %v3379_v53 }
 0x2e8   :  { %v905_v38 = vmax.f32 %v865_v34, 0.0  ;;  %3150 = vmatpush3.bf16.msra.mxu1 %v3379_v53 }
 0x2e9   :  { %v923_v39 = vpack.c.bf16 %v907_v36, %v906_v35  ;;  %3151 = vmatprep.subr.bf16.mxu1 %v3380_v45 }
 0x2ea   :  { %v922_v40 = vpack.c.bf16 %v905_v38, %v904_v37 }
 0x2ec   :  { %3091 = vmatprep.mubr.bf16.mxu1 %v922_v40  ;;  %3152 = vmatpush3.bf16.msra.mxu1 %v3380_v45 }
 0x2ed   :  { %3092 = vmatmul.mubr.bf16.gmra.mrb[76].mxu1 %v923_v39  ;;  %3153 = vmatprep.subr.bf16.mxu1 %v3381_v46 }
 0x2f0   :  { %3154 = vmatpush3.bf16.msra.mxu1 %v3381_v46 }
 0x2f1   :  { %3155 = vmatprep.subr.bf16.mxu1 %v3382_v47 }
 0x2f4   :  { %3156 = vmatpush3.bf16.msra.mxu1 %v3382_v47 }
 0x388   :  { %v3065_v49 = vpop.f32.mrb[48].mxu1 }
 0x389   :  { %v1040_v50 = vadd.f32 %v3065_v49, %v3713_v48  ;;  %v1031_v58 = vpop.f32.mrb[49].mxu1 }
 0x38a   :  { %v1032_v51 = vadd.f32 %v3713_v48, %v1031_v58  ;;  %v3066_v0 = vpop.f32.mrb[50].mxu1 }
 0x38b   :  { %v1043_v52 = vadd.f32 %v3066_v0, %v3713_v48  ;;  %v1034_v54 = vpop.f32.mrb[51].mxu1  ;;  %v1160_v28 = vmax.f32 %v1040_v50, 0.0 }
 0x38c   :  { %v1035_v31 = vadd.f32 %v3713_v48, %v1034_v54  ;;  %v1158_v56 = vmax.f32 %v1032_v51, 0.0 }
 0x38d   :  { %v1161_v55 = vmax.f32 %v1043_v52, 0.0 }
 0x38e   :  { %v1159_v57 = vmax.f32 %v1035_v31, 0.0 }
 0x38f   :  { %v1191_v59 = vpack.c.bf16 %v1161_v55, %v1160_v28 }
 0x390   :  { %v1190_v60 = vpack.c.bf16 %v1159_v57, %v1158_v56  ;;  %v3069_v61 = vpop.f32.mrb[52].mxu1 }
 0x391   :  { %v1056_v62 = vadd.f32 %v3069_v61, %v3713_v48  ;;  %v1047_v63 = vpop.f32.mrb[53].mxu1 }
 0x392   :  { %v1048_v1 = vadd.f32 %v3713_v48, %v1047_v63  ;;  %v3070_v2 = vpop.f32.mrb[54].mxu1  ;;  %3111 = vmatprep.mubr.bf16.mxu0 %v1190_v60 }
 0x393   :  { %v1059_v3 = vadd.f32 %v3070_v2, %v3713_v48  ;;  %v1050_v4 = vpop.f32.mrb[55].mxu1  ;;  %3112 = vmatmul.mubr.bf16.vlgmr.msra.gmra.mrb[48].mxu0 %v1191_v59  ;;  %v1164_v6 = vmax.f32 %v1056_v62, 0.0 }
 0x394   :  { %v1051_v5 = vadd.f32 %v3713_v48, %v1050_v4  ;;  %v1162_v8 = vmax.f32 %v1048_v1, 0.0 }
 0x395   :  { %v1165_v7 = vmax.f32 %v1059_v3, 0.0 }
 0x396   :  { %v1163_v9 = vmax.f32 %v1051_v5, 0.0 }
 0x397   :  { %v1193_v10 = vpack.c.bf16 %v1165_v7, %v1164_v6 }
 0x398   :  { %v1192_v11 = vpack.c.bf16 %v1163_v9, %v1162_v8  ;;  %v3073_v12 = vpop.f32.mrb[56].mxu1 }
 0x399   :  { %v1072_v13 = vadd.f32 %v3073_v12, %v3713_v48  ;;  %v1063_v14 = vpop.f32.mrb[57].mxu1 }
 0x39a   :  { %v1064_v15 = vadd.f32 %v3713_v48, %v1063_v14  ;;  %v3074_v16 = vpop.f32.mrb[58].mxu1  ;;  %3115 = vmatprep.mubr.bf16.mxu0 %v1192_v11 }
 0x39b   :  { %v1075_v17 = vadd.f32 %v3074_v16, %v3713_v48  ;;  %v1066_v18 = vpop.f32.mrb[59].mxu1  ;;  %3116 = vmatmul.mubr.bf16.gmra.mrb[52].mxu0 %v1193_v10  ;;  %v1168_v20 = vmax.f32 %v1072_v13, 0.0 }
 0x39c   :  { %v1067_v19 = vadd.f32 %v3713_v48, %v1066_v18  ;;  %v1166_v22 = vmax.f32 %v1064_v15, 0.0 }
 0x39d   :  { %v1169_v21 = vmax.f32 %v1075_v17, 0.0 }
 0x39e   :  { %v1167_v23 = vmax.f32 %v1067_v19, 0.0 }
 0x39f   :  { %v1195_v24 = vpack.c.bf16 %v1169_v21, %v1168_v20 }
 0x3a0   :  { %v1194_v25 = vpack.c.bf16 %v1167_v23, %v1166_v22  ;;  %v3077_v26 = vpop.f32.mrb[60].mxu1 }
 0x3a1   :  { %v1088_v27 = vadd.f32 %v3077_v26, %v3713_v48  ;;  %v1079_v29 = vpop.f32.mrb[61].mxu1 }
 0x3a2   :  { %v1080_v30 = vadd.f32 %v3713_v48, %v1079_v29  ;;  %v3078_v32 = vpop.f32.mrb[62].mxu1  ;;  %3119 = vmatprep.mubr.bf16.mxu0 %v1194_v25 }
 0x3a3   :  { %v1091_v33 = vadd.f32 %v3078_v32, %v3713_v48  ;;  %v1082_v34 = vpop.f32.mrb[63].mxu1  ;;  %3120 = vmatmul.mubr.bf16.gmra.mrb[56].mxu0 %v1195_v24  ;;  %v1172_v36 = vmax.f32 %v1088_v27, 0.0 }
 0x3a4   :  { %v1083_v35 = vadd.f32 %v3713_v48, %v1082_v34  ;;  %v1170_v38 = vmax.f32 %v1080_v30, 0.0 }
 0x3a5   :  { %v1173_v37 = vmax.f32 %v1091_v33, 0.0 }
 0x3a6   :  { %v1171_v39 = vmax.f32 %v1083_v35, 0.0  ;;  %v3383_v35 = vld [vmem:[#allocation2 + $0x138] sm:$0xff]  }
 0x3a7   :  { %v1197_v40 = vpack.c.bf16 %v1173_v37, %v1172_v36  ;;  %3157 = vmatprep.subr.bf16.mxu1 %v3383_v35  ;;  %v3384_v36 = vld [vmem:[#allocation2 + $0x140] sm:$0xff]   ;;  %v3385_v37 = vld [vmem:[#allocation2 + $0x148] sm:$0xff]  }
 0x3a8   :  { %v1196_v41 = vpack.c.bf16 %v1171_v39, %v1170_v38  ;;  %v3081_v42 = vpop.f32.mrb[64].mxu1  ;;  %3158 = vmatpush3.bf16.msra.mxu1 %v3383_v35  ;;  %3191 = vmatprep.subr.bf16.mxu0 %v3384_v36  ;;  %v3386_v38 = vld [vmem:[#allocation2 + $0x150] sm:$0xff]   ;;  %v3388_v39 = vld [vmem:[#allocation2 + $0x160] sm:$0xff]  }
 0x3a9   :  { %v1104_v43 = vadd.f32 %v3081_v42, %v3713_v48  ;;  %v1095_v44 = vpop.f32.mrb[65].mxu1  ;;  %3192 = vmatpush3.bf16.msra.mxu0 %v3384_v36  ;;  %v3750_v42 = vld [vmem:[%s4063_s3 + $0x4] ss:$0 sm:$0xff] }
 0x3aa   :  { %v1096_v53 = vadd.f32 %v3713_v48, %v1095_v44  ;;  %v3082_v45 = vpop.f32.mrb[66].mxu1  ;;  %3123 = vmatprep.mubr.bf16.mxu0 %v1196_v41  ;;  %3193 = vmatprep.subr.bf16.mxu0 %v3385_v37  ;;  %v3390_v41 = vld [vmem:[#allocation2 + $0x170] sm:$0xff]  }
 0x3ab   :  { %v1107_v46 = vadd.f32 %v3082_v45, %v3713_v48  ;;  %v1098_v47 = vpop.f32.mrb[67].mxu1  ;;  %3124 = vmatmul.mubr.bf16.gmra.mrb[60].mxu0 %v1197_v40  ;;  %v1176_v50 = vmax.f32 %v1104_v43, 0.0  ;;  %v3389_v40 = vld [vmem:[#allocation2 + $0x168] sm:$0xff]  }
 0x3ac   :  { %v1099_v49 = vadd.f32 %v3713_v48, %v1098_v47  ;;  %v1174_v51 = vmax.f32 %v1096_v53, 0.0 }
 0x3ad   :  { %v1177_v58 = vmax.f32 %v1107_v46, 0.0  ;;  %3194 = vmatpush3.bf16.msra.mxu0 %v3385_v37 }
 0x3ae   :  { %v1175_v0 = vmax.f32 %v1099_v49, 0.0  ;;  %3195 = vmatprep.subr.bf16.mxu0 %v3386_v38 }
 0x3af   :  { %v1199_v52 = vpack.c.bf16 %v1177_v58, %v1176_v50 }
 0x3b0   :  { %v1198_v54 = vpack.c.bf16 %v1175_v0, %v1174_v51  ;;  %v3085_v31 = vpop.f32.mrb[68].mxu1 }
 0x3b1   :  { %v1120_v28 = vadd.f32 %v3085_v31, %v3713_v48  ;;  %v1111_v55 = vpop.f32.mrb[69].mxu1  ;;  %3196 = vmatpush3.bf16.msra.mxu0 %v3386_v38 }
 0x3b2   :  { %v1112_v56 = vadd.f32 %v3713_v48, %v1111_v55  ;;  %v3086_v57 = vpop.f32.mrb[70].mxu1  ;;  %3127 = vmatprep.mubr.bf16.mxu0 %v1198_v54 }
 0x3b3   :  { %v1123_v59 = vadd.f32 %v3086_v57, %v3713_v48  ;;  %v1114_v60 = vpop.f32.mrb[71].mxu1  ;;  %3128 = vmatmul.mubr.bf16.gmra.mrb[64].mxu0 %v1199_v52  ;;  %v1180_v62 = vmax.f32 %v1120_v28, 0.0 }
 0x3b4   :  { %v1115_v61 = vadd.f32 %v3713_v48, %v1114_v60  ;;  %v1178_v1 = vmax.f32 %v1112_v56, 0.0 }
 0x3b5   :  { %v1181_v63 = vmax.f32 %v1123_v59, 0.0 }
 0x3b6   :  { %v1179_v2 = vmax.f32 %v1115_v61, 0.0 }
 0x3b7   :  { %v1201_v3 = vpack.c.bf16 %v1181_v63, %v1180_v62 }
 0x3b8   :  { %v1200_v4 = vpack.c.bf16 %v1179_v2, %v1178_v1  ;;  %v3089_v5 = vpop.f32.mrb[72].mxu1 }
 0x3b9   :  { %v1136_v6 = vadd.f32 %v3089_v5, %v3713_v48  ;;  %v1127_v7 = vpop.f32.mrb[73].mxu1 }
 0x3ba   :  { %v1128_v8 = vadd.f32 %v3713_v48, %v1127_v7  ;;  %v3090_v9 = vpop.f32.mrb[74].mxu1  ;;  %3131 = vmatprep.mubr.bf16.mxu0 %v1200_v4 }
 0x3bb   :  { %v1139_v10 = vadd.f32 %v3090_v9, %v3713_v48  ;;  %v1130_v11 = vpop.f32.mrb[75].mxu1  ;;  %3132 = vmatmul.mubr.bf16.gmra.mrb[68].mxu0 %v1201_v3  ;;  %v1184_v13 = vmax.f32 %v1136_v6, 0.0 }
 0x3bc   :  { %v1131_v12 = vadd.f32 %v3713_v48, %v1130_v11  ;;  %v1182_v15 = vmax.f32 %v1128_v8, 0.0 }
 0x3bd   :  { %v1185_v14 = vmax.f32 %v1139_v10, 0.0 }
 0x3be   :  { %v1183_v16 = vmax.f32 %v1131_v12, 0.0 }
 0x3bf   :  { %v1203_v17 = vpack.c.bf16 %v1185_v14, %v1184_v13 }
 0x3c0   :  { %v1202_v18 = vpack.c.bf16 %v1183_v16, %v1182_v15  ;;  %v3093_v19 = vpop.f32.mrb[76].mxu1 }
 0x3c1   :  { %v1152_v20 = vadd.f32 %v3093_v19, %v3713_v48  ;;  %v1143_v21 = vpop.f32.mrb[77].mxu1 }
 0x3c2   :  { %v1144_v22 = vadd.f32 %v3713_v48, %v1143_v21  ;;  %v3094_v23 = vpop.f32.mrb[78].mxu1  ;;  %3135 = vmatprep.mubr.bf16.mxu0 %v1202_v18 }
 0x3c3   :  { %v1155_v24 = vadd.f32 %v3094_v23, %v3713_v48  ;;  %v1146_v25 = vpop.f32.mrb[79].mxu1  ;;  %3136 = vmatmul.mubr.bf16.gmra.mrb[72].mxu0 %v1203_v17  ;;  %v1188_v27 = vmax.f32 %v1152_v20, 0.0 }
 0x3c4   :  { %v1147_v26 = vadd.f32 %v3713_v48, %v1146_v25  ;;  %v1186_v30 = vmax.f32 %v1144_v22, 0.0  ;;  %v3387_v48 = vld [vmem:[#allocation2 + $0x158] sm:$0xff]  }
 0x3c5   :  { %v1189_v29 = vmax.f32 %v1155_v24, 0.0  ;;  %3197 = vmatprep.subr.bf16.mxu0 %v3387_v48 }
 0x3c6   :  { %v1187_v32 = vmax.f32 %v1147_v26, 0.0  ;;  %3198 = vmatpush3.bf16.msra.mxu0 %v3387_v48 }
 0x3c7   :  { %v1205_v33 = vpack.c.bf16 %v1189_v29, %v1188_v27  ;;  %3199 = vmatprep.subr.bf16.mxu0 %v3388_v39 }
 0x3c8   :  { %v1204_v34 = vpack.c.bf16 %v1187_v32, %v1186_v30 }
 0x3ca   :  { %3139 = vmatprep.mubr.bf16.mxu0 %v1204_v34  ;;  %3200 = vmatpush3.bf16.msra.mxu0 %v3388_v39 }
 0x3cb   :  { %3140 = vmatmul.mubr.bf16.gmra.mrb[76].mxu0 %v1205_v33  ;;  %3201 = vmatprep.subr.bf16.mxu0 %v3389_v40 }
 0x3ce   :  { %3202 = vmatpush3.bf16.msra.mxu0 %v3389_v40 }
 0x3cf   :  { %3203 = vmatprep.subr.bf16.mxu0 %v3390_v41 }
 0x3d2   :  { %3204 = vmatpush3.bf16.msra.mxu0 %v3390_v41 }
 0x466   :  { %v3113_v43 = vpop.f32.mrb[48].mxu0 }
 0x467   :  { %v1322_v44 = vadd.f32 %v3113_v43, %v3750_v42  ;;  %v1313_v53 = vpop.f32.mrb[49].mxu0 }
 0x468   :  { %v1314_v45 = vadd.f32 %v3750_v42, %v1313_v53  ;;  %v3114_v46 = vpop.f32.mrb[50].mxu0 }
 0x469   :  { %v1325_v47 = vadd.f32 %v3114_v46, %v3750_v42  ;;  %v1316_v49 = vpop.f32.mrb[51].mxu0  ;;  %v1442_v58 = vmax.f32 %v1322_v44, 0.0 }
 0x46a   :  { %v1317_v50 = vadd.f32 %v3750_v42, %v1316_v49  ;;  %v1440_v0 = vmax.f32 %v1314_v45, 0.0 }
 0x46b   :  { %v1443_v51 = vmax.f32 %v1325_v47, 0.0 }
 0x46c   :  { %v1441_v52 = vmax.f32 %v1317_v50, 0.0 }
 0x46d   :  { %v1473_v54 = vpack.c.bf16 %v1443_v51, %v1442_v58 }
 0x46e   :  { %v1472_v31 = vpack.c.bf16 %v1441_v52, %v1440_v0  ;;  %v3117_v28 = vpop.f32.mrb[52].mxu0 }
 0x46f   :  { %v1338_v55 = vadd.f32 %v3117_v28, %v3750_v42  ;;  %v1329_v56 = vpop.f32.mrb[53].mxu0 }
 0x470   :  { %v1330_v57 = vadd.f32 %v3750_v42, %v1329_v56  ;;  %v3118_v59 = vpop.f32.mrb[54].mxu0  ;;  %3159 = vmatprep.mubr.bf16.mxu1 %v1472_v31 }
 0x471   :  { %v1341_v60 = vadd.f32 %v3118_v59, %v3750_v42  ;;  %v1332_v61 = vpop.f32.mrb[55].mxu0  ;;  %3160 = vmatmul.mubr.bf16.vlgmr.msra.gmra.mrb[80].mxu1 %v1473_v54  ;;  %v1446_v63 = vmax.f32 %v1338_v55, 0.0 }
 0x472   :  { %v1333_v62 = vadd.f32 %v3750_v42, %v1332_v61  ;;  %v1444_v2 = vmax.f32 %v1330_v57, 0.0 }
 0x473   :  { %v1447_v1 = vmax.f32 %v1341_v60, 0.0 }
 0x474   :  { %v1445_v3 = vmax.f32 %v1333_v62, 0.0 }
 0x475   :  { %v1475_v4 = vpack.c.bf16 %v1447_v1, %v1446_v63 }
 0x476   :  { %v1474_v5 = vpack.c.bf16 %v1445_v3, %v1444_v2  ;;  %v3121_v6 = vpop.f32.mrb[56].mxu0 }
 0x477   :  { %v1354_v7 = vadd.f32 %v3121_v6, %v3750_v42  ;;  %v1345_v8 = vpop.f32.mrb[57].mxu0 }
 0x478   :  { %v1346_v9 = vadd.f32 %v3750_v42, %v1345_v8  ;;  %v3122_v10 = vpop.f32.mrb[58].mxu0  ;;  %3163 = vmatprep.mubr.bf16.mxu1 %v1474_v5 }
 0x479   :  { %v1357_v11 = vadd.f32 %v3122_v10, %v3750_v42  ;;  %v1348_v12 = vpop.f32.mrb[59].mxu0  ;;  %3164 = vmatmul.mubr.bf16.gmra.mrb[84].mxu1 %v1475_v4  ;;  %v1450_v14 = vmax.f32 %v1354_v7, 0.0 }
 0x47a   :  { %v1349_v13 = vadd.f32 %v3750_v42, %v1348_v12  ;;  %v1448_v16 = vmax.f32 %v1346_v9, 0.0 }
 0x47b   :  { %v1451_v15 = vmax.f32 %v1357_v11, 0.0 }
 0x47c   :  { %v1449_v17 = vmax.f32 %v1349_v13, 0.0 }
 0x47d   :  { %v1477_v18 = vpack.c.bf16 %v1451_v15, %v1450_v14 }
 0x47e   :  { %v1476_v19 = vpack.c.bf16 %v1449_v17, %v1448_v16  ;;  %v3125_v20 = vpop.f32.mrb[60].mxu0 }
 0x47f   :  { %v1370_v21 = vadd.f32 %v3125_v20, %v3750_v42  ;;  %v1361_v22 = vpop.f32.mrb[61].mxu0 }
 0x480   :  { %v1362_v23 = vadd.f32 %v3750_v42, %v1361_v22  ;;  %v3126_v24 = vpop.f32.mrb[62].mxu0  ;;  %3167 = vmatprep.mubr.bf16.mxu1 %v1476_v19 }
 0x481   :  { %v1373_v25 = vadd.f32 %v3126_v24, %v3750_v42  ;;  %v1364_v26 = vpop.f32.mrb[63].mxu0  ;;  %3168 = vmatmul.mubr.bf16.gmra.mrb[88].mxu1 %v1477_v18  ;;  %v1454_v29 = vmax.f32 %v1370_v21, 0.0 }
 0x482   :  { %v1365_v27 = vadd.f32 %v3750_v42, %v1364_v26  ;;  %v1452_v32 = vmax.f32 %v1362_v23, 0.0 }
 0x483   :  { %v1455_v30 = vmax.f32 %v1373_v25, 0.0 }
 0x484   :  { %v1453_v33 = vmax.f32 %v1365_v27, 0.0  ;;  %v3391_v27 = vld [vmem:[#allocation2 + $0x178] sm:$0xff]  }
 0x485   :  { %v1479_v34 = vpack.c.bf16 %v1455_v30, %v1454_v29  ;;  %3205 = vmatprep.subr.bf16.mxu0 %v3391_v27  ;;  %v3392_v29 = vld [vmem:[#allocation2 + $0x180] sm:$0xff]   ;;  %v3393_v30 = vld [vmem:[#allocation2 + $0x188] sm:$0xff]  }
 0x486   :  { %v1478_v35 = vpack.c.bf16 %v1453_v33, %v1452_v32  ;;  %v3129_v36 = vpop.f32.mrb[64].mxu0  ;;  %3206 = vmatpush3.bf16.msra.mxu0 %v3391_v27  ;;  %3239 = vmatprep.subr.bf16.mxu1 %v3392_v29  ;;  %v3394_v32 = vld [vmem:[#allocation2 + $0x190] sm:$0xff]   ;;  %v3396_v33 = vld [vmem:[#allocation2 + $0x1a0] sm:$0xff]  }
 0x487   :  { %v1386_v37 = vadd.f32 %v3129_v36, %v3750_v42  ;;  %v1377_v38 = vpop.f32.mrb[65].mxu0  ;;  %3240 = vmatpush3.bf16.msra.mxu1 %v3392_v29  ;;  %v3787_v36 = vld [vmem:[%s4063_s3 + $0x5] ss:$0 sm:$0xff] }
 0x488   :  { %v1378_v48 = vadd.f32 %v3750_v42, %v1377_v38  ;;  %v3130_v39 = vpop.f32.mrb[66].mxu0  ;;  %3171 = vmatprep.mubr.bf16.mxu1 %v1478_v35  ;;  %3241 = vmatprep.subr.bf16.mxu1 %v3393_v30  ;;  %v3398_v35 = vld [vmem:[#allocation2 + $0x1b0] sm:$0xff]  }
 0x489   :  { %v1389_v40 = vadd.f32 %v3130_v39, %v3750_v42  ;;  %v1380_v41 = vpop.f32.mrb[67].mxu0  ;;  %3172 = vmatmul.mubr.bf16.gmra.mrb[92].mxu1 %v1479_v34  ;;  %v1458_v44 = vmax.f32 %v1386_v37, 0.0  ;;  %v3397_v34 = vld [vmem:[#allocation2 + $0x1a8] sm:$0xff]  }
 0x48a   :  { %v1381_v43 = vadd.f32 %v3750_v42, %v1380_v41  ;;  %v1456_v45 = vmax.f32 %v1378_v48, 0.0 }
 0x48b   :  { %v1459_v53 = vmax.f32 %v1389_v40, 0.0  ;;  %3242 = vmatpush3.bf16.msra.mxu1 %v3393_v30 }
 0x48c   :  { %v1457_v46 = vmax.f32 %v1381_v43, 0.0  ;;  %3243 = vmatprep.subr.bf16.mxu1 %v3394_v32 }
 0x48d   :  { %v1481_v47 = vpack.c.bf16 %v1459_v53, %v1458_v44 }
 0x48e   :  { %v1480_v49 = vpack.c.bf16 %v1457_v46, %v1456_v45  ;;  %v3133_v50 = vpop.f32.mrb[68].mxu0 }
 0x48f   :  { %v1402_v58 = vadd.f32 %v3133_v50, %v3750_v42  ;;  %v1393_v51 = vpop.f32.mrb[69].mxu0  ;;  %3244 = vmatpush3.bf16.msra.mxu1 %v3394_v32 }
 0x490   :  { %v1394_v0 = vadd.f32 %v3750_v42, %v1393_v51  ;;  %v3134_v52 = vpop.f32.mrb[70].mxu0  ;;  %3175 = vmatprep.mubr.bf16.mxu1 %v1480_v49 }
 0x491   :  { %v1405_v54 = vadd.f32 %v3134_v52, %v3750_v42  ;;  %v1396_v31 = vpop.f32.mrb[71].mxu0  ;;  %3176 = vmatmul.mubr.bf16.gmra.mrb[96].mxu1 %v1481_v47  ;;  %v1462_v55 = vmax.f32 %v1402_v58, 0.0 }
 0x492   :  { %v1397_v28 = vadd.f32 %v3750_v42, %v1396_v31  ;;  %v1460_v57 = vmax.f32 %v1394_v0, 0.0 }
 0x493   :  { %v1463_v56 = vmax.f32 %v1405_v54, 0.0 }
 0x494   :  { %v1461_v59 = vmax.f32 %v1397_v28, 0.0 }
 0x495   :  { %v1483_v60 = vpack.c.bf16 %v1463_v56, %v1462_v55 }
 0x496   :  { %v1482_v61 = vpack.c.bf16 %v1461_v59, %v1460_v57  ;;  %v3137_v62 = vpop.f32.mrb[72].mxu0 }
 0x497   :  { %v1418_v63 = vadd.f32 %v3137_v62, %v3750_v42  ;;  %v1409_v1 = vpop.f32.mrb[73].mxu0 }
 0x498   :  { %v1410_v2 = vadd.f32 %v3750_v42, %v1409_v1  ;;  %v3138_v3 = vpop.f32.mrb[74].mxu0  ;;  %3179 = vmatprep.mubr.bf16.mxu1 %v1482_v61 }
 0x499   :  { %v1421_v4 = vadd.f32 %v3138_v3, %v3750_v42  ;;  %v1412_v5 = vpop.f32.mrb[75].mxu0  ;;  %3180 = vmatmul.mubr.bf16.gmra.mrb[100].mxu1 %v1483_v60  ;;  %v1466_v7 = vmax.f32 %v1418_v63, 0.0 }
 0x49a   :  { %v1413_v6 = vadd.f32 %v3750_v42, %v1412_v5  ;;  %v1464_v9 = vmax.f32 %v1410_v2, 0.0 }
 0x49b   :  { %v1467_v8 = vmax.f32 %v1421_v4, 0.0 }
 0x49c   :  { %v1465_v10 = vmax.f32 %v1413_v6, 0.0 }
 0x49d   :  { %v1485_v11 = vpack.c.bf16 %v1467_v8, %v1466_v7 }
 0x49e   :  { %v1484_v12 = vpack.c.bf16 %v1465_v10, %v1464_v9  ;;  %v3141_v13 = vpop.f32.mrb[76].mxu0 }
 0x49f   :  { %v1434_v14 = vadd.f32 %v3141_v13, %v3750_v42  ;;  %v1425_v15 = vpop.f32.mrb[77].mxu0 }
 0x4a0   :  { %v1426_v16 = vadd.f32 %v3750_v42, %v1425_v15  ;;  %v3142_v17 = vpop.f32.mrb[78].mxu0  ;;  %3183 = vmatprep.mubr.bf16.mxu1 %v1484_v12 }
 0x4a1   :  { %v1437_v18 = vadd.f32 %v3142_v17, %v3750_v42  ;;  %v1428_v19 = vpop.f32.mrb[79].mxu0  ;;  %3184 = vmatmul.mubr.bf16.gmra.mrb[104].mxu1 %v1485_v11  ;;  %v1470_v21 = vmax.f32 %v1434_v14, 0.0 }
 0x4a2   :  { %v1429_v20 = vadd.f32 %v3750_v42, %v1428_v19  ;;  %v1468_v23 = vmax.f32 %v1426_v16, 0.0  ;;  %v3395_v42 = vld [vmem:[#allocation2 + $0x198] sm:$0xff]  }
 0x4a3   :  { %v1471_v22 = vmax.f32 %v1437_v18, 0.0  ;;  %3245 = vmatprep.subr.bf16.mxu1 %v3395_v42 }
 0x4a4   :  { %v1469_v24 = vmax.f32 %v1429_v20, 0.0  ;;  %3246 = vmatpush3.bf16.msra.mxu1 %v3395_v42 }
 0x4a5   :  { %v1487_v25 = vpack.c.bf16 %v1471_v22, %v1470_v21  ;;  %3247 = vmatprep.subr.bf16.mxu1 %v3396_v33 }
 0x4a6   :  { %v1486_v26 = vpack.c.bf16 %v1469_v24, %v1468_v23 }
 0x4a8   :  { %3187 = vmatprep.mubr.bf16.mxu1 %v1486_v26  ;;  %3248 = vmatpush3.bf16.msra.mxu1 %v3396_v33 }
 0x4a9   :  { %3188 = vmatmul.mubr.bf16.gmra.mrb[108].mxu1 %v1487_v25  ;;  %3249 = vmatprep.subr.bf16.mxu1 %v3397_v34 }
 0x4ac   :  { %3250 = vmatpush3.bf16.msra.mxu1 %v3397_v34 }
 0x4ad   :  { %3251 = vmatprep.subr.bf16.mxu1 %v3398_v35 }
 0x4b0   :  { %3252 = vmatpush3.bf16.msra.mxu1 %v3398_v35 }
 0x544   :  { %v3161_v37 = vpop.f32.mrb[80].mxu1 }
 0x545   :  { %v1604_v38 = vadd.f32 %v3161_v37, %v3787_v36  ;;  %v1595_v48 = vpop.f32.mrb[81].mxu1 }
 0x546   :  { %v1596_v39 = vadd.f32 %v3787_v36, %v1595_v48  ;;  %v3162_v40 = vpop.f32.mrb[82].mxu1 }
 0x547   :  { %v1607_v41 = vadd.f32 %v3162_v40, %v3787_v36  ;;  %v1598_v43 = vpop.f32.mrb[83].mxu1  ;;  %v1724_v53 = vmax.f32 %v1604_v38, 0.0 }
 0x548   :  { %v1599_v44 = vadd.f32 %v3787_v36, %v1598_v43  ;;  %v1722_v46 = vmax.f32 %v1596_v39, 0.0 }
 0x549   :  { %v1725_v45 = vmax.f32 %v1607_v41, 0.0 }
 0x54a   :  { %v1723_v47 = vmax.f32 %v1599_v44, 0.0 }
 0x54b   :  { %v1755_v49 = vpack.c.bf16 %v1725_v45, %v1724_v53 }
 0x54c   :  { %v1754_v50 = vpack.c.bf16 %v1723_v47, %v1722_v46  ;;  %v3165_v58 = vpop.f32.mrb[84].mxu1 }
 0x54d   :  { %v1620_v51 = vadd.f32 %v3165_v58, %v3787_v36  ;;  %v1611_v0 = vpop.f32.mrb[85].mxu1 }
 0x54e   :  { %v1612_v52 = vadd.f32 %v3787_v36, %v1611_v0  ;;  %v3166_v54 = vpop.f32.mrb[86].mxu1  ;;  %3207 = vmatprep.mubr.bf16.mxu0 %v1754_v50 }
 0x54f   :  { %v1623_v31 = vadd.f32 %v3166_v54, %v3787_v36  ;;  %v1614_v28 = vpop.f32.mrb[87].mxu1  ;;  %3208 = vmatmul.mubr.bf16.vlgmr.msra.gmra.mrb[80].mxu0 %v1755_v49  ;;  %v1728_v56 = vmax.f32 %v1620_v51, 0.0 }
 0x550   :  { %v1615_v55 = vadd.f32 %v3787_v36, %v1614_v28  ;;  %v1726_v59 = vmax.f32 %v1612_v52, 0.0 }
 0x551   :  { %v1729_v57 = vmax.f32 %v1623_v31, 0.0 }
 0x552   :  { %v1727_v60 = vmax.f32 %v1615_v55, 0.0 }
 0x553   :  { %v1757_v61 = vpack.c.bf16 %v1729_v57, %v1728_v56 }
 0x554   :  { %v1756_v62 = vpack.c.bf16 %v1727_v60, %v1726_v59  ;;  %v3169_v63 = vpop.f32.mrb[88].mxu1 }
 0x555   :  { %v1636_v1 = vadd.f32 %v3169_v63, %v3787_v36  ;;  %v1627_v2 = vpop.f32.mrb[89].mxu1 }
 0x556   :  { %v1628_v3 = vadd.f32 %v3787_v36, %v1627_v2  ;;  %v3170_v4 = vpop.f32.mrb[90].mxu1  ;;  %3211 = vmatprep.mubr.bf16.mxu0 %v1756_v62 }
 0x557   :  { %v1639_v5 = vadd.f32 %v3170_v4, %v3787_v36  ;;  %v1630_v6 = vpop.f32.mrb[91].mxu1  ;;  %3212 = vmatmul.mubr.bf16.gmra.mrb[84].mxu0 %v1757_v61  ;;  %v1732_v8 = vmax.f32 %v1636_v1, 0.0 }
 0x558   :  { %v1631_v7 = vadd.f32 %v3787_v36, %v1630_v6  ;;  %v1730_v10 = vmax.f32 %v1628_v3, 0.0 }
 0x559   :  { %v1733_v9 = vmax.f32 %v1639_v5, 0.0 }
 0x55a   :  { %v1731_v11 = vmax.f32 %v1631_v7, 0.0 }
 0x55b   :  { %v1759_v12 = vpack.c.bf16 %v1733_v9, %v1732_v8 }
 0x55c   :  { %v1758_v13 = vpack.c.bf16 %v1731_v11, %v1730_v10  ;;  %v3173_v14 = vpop.f32.mrb[92].mxu1 }
 0x55d   :  { %v1652_v15 = vadd.f32 %v3173_v14, %v3787_v36  ;;  %v1643_v16 = vpop.f32.mrb[93].mxu1 }
 0x55e   :  { %v1644_v17 = vadd.f32 %v3787_v36, %v1643_v16  ;;  %v3174_v18 = vpop.f32.mrb[94].mxu1  ;;  %3215 = vmatprep.mubr.bf16.mxu0 %v1758_v13 }
 0x55f   :  { %v1655_v19 = vadd.f32 %v3174_v18, %v3787_v36  ;;  %v1646_v20 = vpop.f32.mrb[95].mxu1  ;;  %3216 = vmatmul.mubr.bf16.gmra.mrb[88].mxu0 %v1759_v12  ;;  %v1736_v22 = vmax.f32 %v1652_v15, 0.0 }
 0x560   :  { %v1647_v21 = vadd.f32 %v3787_v36, %v1646_v20  ;;  %v1734_v24 = vmax.f32 %v1644_v17, 0.0 }
 0x561   :  { %v1737_v23 = vmax.f32 %v1655_v19, 0.0 }
 0x562   :  { %v1735_v25 = vmax.f32 %v1647_v21, 0.0  ;;  %v3399_v21 = vld [vmem:[#allocation2 + $0x1b8] sm:$0xff]  }
 0x563   :  { %v1761_v26 = vpack.c.bf16 %v1737_v23, %v1736_v22  ;;  %3253 = vmatprep.subr.bf16.mxu1 %v3399_v21  ;;  %v3400_v22 = vld [vmem:[#allocation2 + $0x1c0] sm:$0xff]   ;;  %v3401_v23 = vld [vmem:[#allocation2 + $0x1c8] sm:$0xff]  }
 0x564   :  { %v1760_v27 = vpack.c.bf16 %v1735_v25, %v1734_v24  ;;  %v3177_v29 = vpop.f32.mrb[96].mxu1  ;;  %3254 = vmatpush3.bf16.msra.mxu1 %v3399_v21  ;;  %3287 = vmatprep.subr.bf16.mxu0 %v3400_v22  ;;  %v3402_v24 = vld [vmem:[#allocation2 + $0x1d0] sm:$0xff]   ;;  %v3404_v25 = vld [vmem:[#allocation2 + $0x1e0] sm:$0xff]  }
 0x565   :  { %v1668_v30 = vadd.f32 %v3177_v29, %v3787_v36  ;;  %v1659_v32 = vpop.f32.mrb[97].mxu1  ;;  %3288 = vmatpush3.bf16.msra.mxu0 %v3400_v22  ;;  %v3824_v29 = vld [vmem:[%s4063_s3 + $0x6] ss:$0 sm:$0xff] }
 0x566   :  { %v1660_v42 = vadd.f32 %v3787_v36, %v1659_v32  ;;  %v3178_v33 = vpop.f32.mrb[98].mxu1  ;;  %3219 = vmatprep.mubr.bf16.mxu0 %v1760_v27  ;;  %3289 = vmatprep.subr.bf16.mxu0 %v3401_v23  ;;  %v3406_v27 = vld [vmem:[#allocation2 + $0x1f0] sm:$0xff]  }
 0x567   :  { %v1671_v34 = vadd.f32 %v3178_v33, %v3787_v36  ;;  %v1662_v35 = vpop.f32.mrb[99].mxu1  ;;  %3220 = vmatmul.mubr.bf16.gmra.mrb[92].mxu0 %v1761_v26  ;;  %v1740_v38 = vmax.f32 %v1668_v30, 0.0  ;;  %v3405_v26 = vld [vmem:[#allocation2 + $0x1e8] sm:$0xff]  }
 0x568   :  { %v1663_v37 = vadd.f32 %v3787_v36, %v1662_v35  ;;  %v1738_v39 = vmax.f32 %v1660_v42, 0.0 }
 0x569   :  { %v1741_v48 = vmax.f32 %v1671_v34, 0.0  ;;  %3290 = vmatpush3.bf16.msra.mxu0 %v3401_v23 }
 0x56a   :  { %v1739_v40 = vmax.f32 %v1663_v37, 0.0  ;;  %3291 = vmatprep.subr.bf16.mxu0 %v3402_v24 }
 0x56b   :  { %v1763_v41 = vpack.c.bf16 %v1741_v48, %v1740_v38 }
 0x56c   :  { %v1762_v43 = vpack.c.bf16 %v1739_v40, %v1738_v39  ;;  %v3181_v44 = vpop.f32.mrb[100].mxu1 }
 0x56d   :  { %v1684_v53 = vadd.f32 %v3181_v44, %v3787_v36  ;;  %v1675_v45 = vpop.f32.mrb[101].mxu1  ;;  %3292 = vmatpush3.bf16.msra.mxu0 %v3402_v24 }
 0x56e   :  { %v1676_v46 = vadd.f32 %v3787_v36, %v1675_v45  ;;  %v3182_v47 = vpop.f32.mrb[102].mxu1  ;;  %3223 = vmatprep.mubr.bf16.mxu0 %v1762_v43 }
 0x56f   :  { %v1687_v49 = vadd.f32 %v3182_v47, %v3787_v36  ;;  %v1678_v50 = vpop.f32.mrb[103].mxu1  ;;  %3224 = vmatmul.mubr.bf16.gmra.mrb[96].mxu0 %v1763_v41  ;;  %v1744_v51 = vmax.f32 %v1684_v53, 0.0 }
 0x570   :  { %v1679_v58 = vadd.f32 %v3787_v36, %v1678_v50  ;;  %v1742_v52 = vmax.f32 %v1676_v46, 0.0 }
 0x571   :  { %v1745_v0 = vmax.f32 %v1687_v49, 0.0 }
 0x572   :  { %v1743_v54 = vmax.f32 %v1679_v58, 0.0 }
 0x573   :  { %v1765_v31 = vpack.c.bf16 %v1745_v0, %v1744_v51 }
 0x574   :  { %v1764_v28 = vpack.c.bf16 %v1743_v54, %v1742_v52  ;;  %v3185_v55 = vpop.f32.mrb[104].mxu1 }
 0x575   :  { %v1700_v56 = vadd.f32 %v3185_v55, %v3787_v36  ;;  %v1691_v57 = vpop.f32.mrb[105].mxu1 }
 0x576   :  { %v1692_v59 = vadd.f32 %v3787_v36, %v1691_v57  ;;  %v3186_v60 = vpop.f32.mrb[106].mxu1  ;;  %3227 = vmatprep.mubr.bf16.mxu0 %v1764_v28 }
 0x577   :  { %v1703_v61 = vadd.f32 %v3186_v60, %v3787_v36  ;;  %v1694_v62 = vpop.f32.mrb[107].mxu1  ;;  %3228 = vmatmul.mubr.bf16.gmra.mrb[100].mxu0 %v1765_v31  ;;  %v1748_v1 = vmax.f32 %v1700_v56, 0.0 }
 0x578   :  { %v1695_v63 = vadd.f32 %v3787_v36, %v1694_v62  ;;  %v1746_v3 = vmax.f32 %v1692_v59, 0.0 }
 0x579   :  { %v1749_v2 = vmax.f32 %v1703_v61, 0.0 }
 0x57a   :  { %v1747_v4 = vmax.f32 %v1695_v63, 0.0 }
 0x57b   :  { %v1767_v5 = vpack.c.bf16 %v1749_v2, %v1748_v1 }
 0x57c   :  { %v1766_v6 = vpack.c.bf16 %v1747_v4, %v1746_v3  ;;  %v3189_v7 = vpop.f32.mrb[108].mxu1 }
 0x57d   :  { %v1716_v8 = vadd.f32 %v3189_v7, %v3787_v36  ;;  %v1707_v9 = vpop.f32.mrb[109].mxu1 }
 0x57e   :  { %v1708_v10 = vadd.f32 %v3787_v36, %v1707_v9  ;;  %v3190_v11 = vpop.f32.mrb[110].mxu1  ;;  %3231 = vmatprep.mubr.bf16.mxu0 %v1766_v6 }
 0x57f   :  { %v1719_v12 = vadd.f32 %v3190_v11, %v3787_v36  ;;  %v1710_v13 = vpop.f32.mrb[111].mxu1  ;;  %3232 = vmatmul.mubr.bf16.gmra.mrb[104].mxu0 %v1767_v5  ;;  %v1752_v15 = vmax.f32 %v1716_v8, 0.0 }
 0x580   :  { %v1711_v14 = vadd.f32 %v3787_v36, %v1710_v13  ;;  %v1750_v17 = vmax.f32 %v1708_v10, 0.0  ;;  %v3403_v36 = vld [vmem:[#allocation2 + $0x1d8] sm:$0xff]  }
 0x581   :  { %v1753_v16 = vmax.f32 %v1719_v12, 0.0  ;;  %3293 = vmatprep.subr.bf16.mxu0 %v3403_v36 }
 0x582   :  { %v1751_v18 = vmax.f32 %v1711_v14, 0.0  ;;  %3294 = vmatpush3.bf16.msra.mxu0 %v3403_v36 }
 0x583   :  { %v1769_v19 = vpack.c.bf16 %v1753_v16, %v1752_v15  ;;  %3295 = vmatprep.subr.bf16.mxu0 %v3404_v25 }
 0x584   :  { %v1768_v20 = vpack.c.bf16 %v1751_v18, %v1750_v17 }
 0x586   :  { %3235 = vmatprep.mubr.bf16.mxu0 %v1768_v20  ;;  %3296 = vmatpush3.bf16.msra.mxu0 %v3404_v25 }
 0x587   :  { %3236 = vmatmul.mubr.bf16.gmra.mrb[108].mxu0 %v1769_v19  ;;  %3297 = vmatprep.subr.bf16.mxu0 %v3405_v26 }
 0x58a   :  { %3298 = vmatpush3.bf16.msra.mxu0 %v3405_v26 }
 0x58b   :  { %3299 = vmatprep.subr.bf16.mxu0 %v3406_v27 }
 0x58e   :  { %3300 = vmatpush3.bf16.msra.mxu0 %v3406_v27 }
 0x622   :  { %v3209_v30 = vpop.f32.mrb[80].mxu0 }
 0x623   :  { %v1886_v32 = vadd.f32 %v3209_v30, %v3824_v29  ;;  %v1877_v42 = vpop.f32.mrb[81].mxu0 }
 0x624   :  { %v1878_v33 = vadd.f32 %v3824_v29, %v1877_v42  ;;  %v3210_v34 = vpop.f32.mrb[82].mxu0 }
 0x625   :  { %v1889_v35 = vadd.f32 %v3210_v34, %v3824_v29  ;;  %v1880_v37 = vpop.f32.mrb[83].mxu0  ;;  %v2006_v48 = vmax.f32 %v1886_v32, 0.0 }
 0x626   :  { %v1881_v38 = vadd.f32 %v3824_v29, %v1880_v37  ;;  %v2004_v40 = vmax.f32 %v1878_v33, 0.0 }
 0x627   :  { %v2007_v39 = vmax.f32 %v1889_v35, 0.0 }
 0x628   :  { %v2005_v41 = vmax.f32 %v1881_v38, 0.0 }
 0x629   :  { %v2037_v43 = vpack.c.bf16 %v2007_v39, %v2006_v48 }
 0x62a   :  { %v2036_v44 = vpack.c.bf16 %v2005_v41, %v2004_v40  ;;  %v3213_v53 = vpop.f32.mrb[84].mxu0 }
 0x62b   :  { %v1902_v45 = vadd.f32 %v3213_v53, %v3824_v29  ;;  %v1893_v46 = vpop.f32.mrb[85].mxu0 }
 0x62c   :  { %v1894_v47 = vadd.f32 %v3824_v29, %v1893_v46  ;;  %v3214_v49 = vpop.f32.mrb[86].mxu0  ;;  %3255 = vmatprep.mubr.bf16.mxu1 %v2036_v44 }
 0x62d   :  { %v1905_v50 = vadd.f32 %v3214_v49, %v3824_v29  ;;  %v1896_v58 = vpop.f32.mrb[87].mxu0  ;;  %3256 = vmatmul.mubr.bf16.vlgmr.msra.gmra.mrb[112].mxu1 %v2037_v43  ;;  %v2010_v0 = vmax.f32 %v1902_v45, 0.0 }
 0x62e   :  { %v1897_v51 = vadd.f32 %v3824_v29, %v1896_v58  ;;  %v2008_v54 = vmax.f32 %v1894_v47, 0.0 }
 0x62f   :  { %v2011_v52 = vmax.f32 %v1905_v50, 0.0 }
 0x630   :  { %v2009_v31 = vmax.f32 %v1897_v51, 0.0 }
 0x631   :  { %v2039_v28 = vpack.c.bf16 %v2011_v52, %v2010_v0 }
 0x632   :  { %v2038_v55 = vpack.c.bf16 %v2009_v31, %v2008_v54  ;;  %v3217_v56 = vpop.f32.mrb[88].mxu0 }
 0x633   :  { %v1918_v57 = vadd.f32 %v3217_v56, %v3824_v29  ;;  %v1909_v59 = vpop.f32.mrb[89].mxu0 }
 0x634   :  { %v1910_v60 = vadd.f32 %v3824_v29, %v1909_v59  ;;  %v3218_v61 = vpop.f32.mrb[90].mxu0  ;;  %3259 = vmatprep.mubr.bf16.mxu1 %v2038_v55 }
 0x635   :  { %v1921_v62 = vadd.f32 %v3218_v61, %v3824_v29  ;;  %v1912_v63 = vpop.f32.mrb[91].mxu0  ;;  %3260 = vmatmul.mubr.bf16.gmra.mrb[116].mxu1 %v2039_v28  ;;  %v2014_v2 = vmax.f32 %v1918_v57, 0.0 }
 0x636   :  { %v1913_v1 = vadd.f32 %v3824_v29, %v1912_v63  ;;  %v2012_v4 = vmax.f32 %v1910_v60, 0.0 }
 0x637   :  { %v2015_v3 = vmax.f32 %v1921_v62, 0.0 }
 0x638   :  { %v2013_v5 = vmax.f32 %v1913_v1, 0.0 }
 0x639   :  { %v2041_v6 = vpack.c.bf16 %v2015_v3, %v2014_v2 }
 0x63a   :  { %v2040_v7 = vpack.c.bf16 %v2013_v5, %v2012_v4  ;;  %v3221_v8 = vpop.f32.mrb[92].mxu0 }
 0x63b   :  { %v1934_v9 = vadd.f32 %v3221_v8, %v3824_v29  ;;  %v1925_v10 = vpop.f32.mrb[93].mxu0 }
 0x63c   :  { %v1926_v11 = vadd.f32 %v3824_v29, %v1925_v10  ;;  %v3222_v12 = vpop.f32.mrb[94].mxu0  ;;  %3263 = vmatprep.mubr.bf16.mxu1 %v2040_v7 }
 0x63d   :  { %v1937_v13 = vadd.f32 %v3222_v12, %v3824_v29  ;;  %v1928_v14 = vpop.f32.mrb[95].mxu0  ;;  %3264 = vmatmul.mubr.bf16.gmra.mrb[120].mxu1 %v2041_v6  ;;  %v2018_v16 = vmax.f32 %v1934_v9, 0.0 }
 0x63e   :  { %v1929_v15 = vadd.f32 %v3824_v29, %v1928_v14  ;;  %v2016_v18 = vmax.f32 %v1926_v11, 0.0 }
 0x63f   :  { %v2019_v17 = vmax.f32 %v1937_v13, 0.0 }
 0x640   :  { %v2017_v19 = vmax.f32 %v1929_v15, 0.0  ;;  %v3407_v15 = vld [vmem:[#allocation2 + $0x1f8] sm:$0xff]  }
 0x641   :  { %v2043_v20 = vpack.c.bf16 %v2019_v17, %v2018_v16  ;;  %3301 = vmatprep.subr.bf16.mxu0 %v3407_v15  ;;  %v3861_v16 = vld [vmem:[%s4063_s3 + $0x7] ss:$0 sm:$0xff] }
 0x642   :  { %v2042_v21 = vpack.c.bf16 %v2017_v19, %v2016_v18  ;;  %v3225_v22 = vpop.f32.mrb[96].mxu0  ;;  %3302 = vmatpush3.bf16.msra.mxu0 %v3407_v15 }
 0x643   :  { %v1950_v23 = vadd.f32 %v3225_v22, %v3824_v29  ;;  %v1941_v24 = vpop.f32.mrb[97].mxu0 }
 0x644   :  { %v1942_v36 = vadd.f32 %v3824_v29, %v1941_v24  ;;  %v3226_v25 = vpop.f32.mrb[98].mxu0  ;;  %3267 = vmatprep.mubr.bf16.mxu1 %v2042_v21 }
 0x645   :  { %v1953_v26 = vadd.f32 %v3226_v25, %v3824_v29  ;;  %v1944_v27 = vpop.f32.mrb[99].mxu0  ;;  %3268 = vmatmul.mubr.bf16.gmra.mrb[124].mxu1 %v2043_v20  ;;  %v2022_v32 = vmax.f32 %v1950_v23, 0.0 }
 0x646   :  { %v1945_v30 = vadd.f32 %v3824_v29, %v1944_v27  ;;  %v2020_v33 = vmax.f32 %v1942_v36, 0.0 }
 0x647   :  { %v2023_v42 = vmax.f32 %v1953_v26, 0.0 }
 0x648   :  { %v2021_v34 = vmax.f32 %v1945_v30, 0.0 }
 0x649   :  { %v2045_v35 = vpack.c.bf16 %v2023_v42, %v2022_v32 }
 0x64a   :  { %v2044_v37 = vpack.c.bf16 %v2021_v34, %v2020_v33  ;;  %v3229_v38 = vpop.f32.mrb[100].mxu0 }
 0x64b   :  { %v1966_v48 = vadd.f32 %v3229_v38, %v3824_v29  ;;  %v1957_v39 = vpop.f32.mrb[101].mxu0 }
 0x64c   :  { %v1958_v40 = vadd.f32 %v3824_v29, %v1957_v39  ;;  %v3230_v41 = vpop.f32.mrb[102].mxu0  ;;  %3271 = vmatprep.mubr.bf16.mxu1 %v2044_v37 }
 0x64d   :  { %v1969_v43 = vadd.f32 %v3230_v41, %v3824_v29  ;;  %v1960_v44 = vpop.f32.mrb[103].mxu0  ;;  %3272 = vmatmul.mubr.bf16.gmra.mrb[128].mxu1 %v2045_v35  ;;  %v2026_v45 = vmax.f32 %v1966_v48, 0.0 }
 0x64e   :  { %v1961_v53 = vadd.f32 %v3824_v29, %v1960_v44  ;;  %v2024_v47 = vmax.f32 %v1958_v40, 0.0 }
 0x64f   :  { %v2027_v46 = vmax.f32 %v1969_v43, 0.0 }
 0x650   :  { %v2025_v49 = vmax.f32 %v1961_v53, 0.0 }
 0x651   :  { %v2047_v50 = vpack.c.bf16 %v2027_v46, %v2026_v45 }
 0x652   :  { %v2046_v58 = vpack.c.bf16 %v2025_v49, %v2024_v47  ;;  %v3233_v51 = vpop.f32.mrb[104].mxu0 }
 0x653   :  { %v1982_v0 = vadd.f32 %v3233_v51, %v3824_v29  ;;  %v1973_v52 = vpop.f32.mrb[105].mxu0 }
 0x654   :  { %v1974_v54 = vadd.f32 %v3824_v29, %v1973_v52  ;;  %v3234_v31 = vpop.f32.mrb[106].mxu0  ;;  %3275 = vmatprep.mubr.bf16.mxu1 %v2046_v58 }
 0x655   :  { %v1985_v28 = vadd.f32 %v3234_v31, %v3824_v29  ;;  %v1976_v55 = vpop.f32.mrb[107].mxu0  ;;  %3276 = vmatmul.mubr.bf16.gmra.mrb[132].mxu1 %v2047_v50  ;;  %v2030_v57 = vmax.f32 %v1982_v0, 0.0 }
 0x656   :  { %v1977_v56 = vadd.f32 %v3824_v29, %v1976_v55  ;;  %v2028_v60 = vmax.f32 %v1974_v54, 0.0 }
 0x657   :  { %v2031_v59 = vmax.f32 %v1985_v28, 0.0 }
 0x658   :  { %v2029_v61 = vmax.f32 %v1977_v56, 0.0 }
 0x659   :  { %v2049_v62 = vpack.c.bf16 %v2031_v59, %v2030_v57 }
 0x65a   :  { %v2048_v63 = vpack.c.bf16 %v2029_v61, %v2028_v60  ;;  %v3237_v1 = vpop.f32.mrb[108].mxu0 }
 0x65b   :  { %v1998_v2 = vadd.f32 %v3237_v1, %v3824_v29  ;;  %v1989_v3 = vpop.f32.mrb[109].mxu0 }
 0x65c   :  { %v1990_v4 = vadd.f32 %v3824_v29, %v1989_v3  ;;  %v3238_v5 = vpop.f32.mrb[110].mxu0  ;;  %3279 = vmatprep.mubr.bf16.mxu1 %v2048_v63 }
 0x65d   :  { %v2001_v6 = vadd.f32 %v3238_v5, %v3824_v29  ;;  %v1992_v7 = vpop.f32.mrb[111].mxu0  ;;  %3280 = vmatmul.mubr.bf16.gmra.mrb[136].mxu1 %v2049_v62  ;;  %v2034_v9 = vmax.f32 %v1998_v2, 0.0 }
 0x65e   :  { %v1993_v8 = vadd.f32 %v3824_v29, %v1992_v7  ;;  %v2032_v11 = vmax.f32 %v1990_v4, 0.0 }
 0x65f   :  { %v2035_v10 = vmax.f32 %v2001_v6, 0.0 }
 0x660   :  { %v2033_v12 = vmax.f32 %v1993_v8, 0.0 }
 0x661   :  { %v2051_v13 = vpack.c.bf16 %v2035_v10, %v2034_v9 }
 0x662   :  { %v2050_v14 = vpack.c.bf16 %v2033_v12, %v2032_v11 }
 0x664   :  { %3283 = vmatprep.mubr.bf16.mxu1 %v2050_v14 }
 0x665   :  { %3284 = vmatmul.mubr.bf16.gmra.mrb[140].mxu1 %v2051_v13 }
 0x700   :  { %v3257_v17 = vpop.f32.mrb[112].mxu1 }
 0x701   :  { %v2168_v18 = vadd.f32 %v3257_v17, %v3861_v16  ;;  %v2159_v29 = vpop.f32.mrb[113].mxu1 }
 0x702   :  { %v2160_v19 = vadd.f32 %v3861_v16, %v2159_v29  ;;  %v3258_v20 = vpop.f32.mrb[114].mxu1 }
 0x703   :  { %v2171_v21 = vadd.f32 %v3258_v20, %v3861_v16  ;;  %v2162_v22 = vpop.f32.mrb[115].mxu1  ;;  %v2288_v24 = vmax.f32 %v2168_v18, 0.0 }
 0x704   :  { %v2163_v23 = vadd.f32 %v3861_v16, %v2162_v22  ;;  %v2286_v25 = vmax.f32 %v2160_v19, 0.0 }
 0x705   :  { %v2289_v36 = vmax.f32 %v2171_v21, 0.0 }
 0x706   :  { %v2287_v26 = vmax.f32 %v2163_v23, 0.0 }
 0x707   :  { %v2319_v27 = vpack.c.bf16 %v2289_v36, %v2288_v24 }
 0x708   :  { %v2318_v30 = vpack.c.bf16 %v2287_v26, %v2286_v25  ;;  %v3261_v32 = vpop.f32.mrb[116].mxu1 }
 0x709   :  { %v2184_v42 = vadd.f32 %v3261_v32, %v3861_v16  ;;  %v2175_v33 = vpop.f32.mrb[117].mxu1 }
 0x70a   :  { %v2176_v34 = vadd.f32 %v3861_v16, %v2175_v33  ;;  %v3262_v35 = vpop.f32.mrb[118].mxu1  ;;  %3303 = vmatprep.mubr.bf16.mxu0 %v2318_v30 }
 0x70b   :  { %v2187_v37 = vadd.f32 %v3262_v35, %v3861_v16  ;;  %v2178_v38 = vpop.f32.mrb[119].mxu1  ;;  %3304 = vmatmul.mubr.bf16.vlgmr.msra.gmra.mrb[112].mxu0 %v2319_v27  ;;  %v2292_v39 = vmax.f32 %v2184_v42, 0.0 }
 0x70c   :  { %v2179_v48 = vadd.f32 %v3861_v16, %v2178_v38  ;;  %v2290_v41 = vmax.f32 %v2176_v34, 0.0 }
 0x70d   :  { %v2293_v40 = vmax.f32 %v2187_v37, 0.0 }
 0x70e   :  { %v2291_v43 = vmax.f32 %v2179_v48, 0.0 }
 0x70f   :  { %v2321_v44 = vpack.c.bf16 %v2293_v40, %v2292_v39 }
 0x710   :  { %v2320_v53 = vpack.c.bf16 %v2291_v43, %v2290_v41  ;;  %v3265_v45 = vpop.f32.mrb[120].mxu1 }
 0x711   :  { %v2200_v46 = vadd.f32 %v3265_v45, %v3861_v16  ;;  %v2191_v47 = vpop.f32.mrb[121].mxu1 }
 0x712   :  { %v2192_v49 = vadd.f32 %v3861_v16, %v2191_v47  ;;  %v3266_v50 = vpop.f32.mrb[122].mxu1  ;;  %3307 = vmatprep.mubr.bf16.mxu0 %v2320_v53 }
 0x713   :  { %v2203_v58 = vadd.f32 %v3266_v50, %v3861_v16  ;;  %v2194_v51 = vpop.f32.mrb[123].mxu1  ;;  %3308 = vmatmul.mubr.bf16.gmra.mrb[116].mxu0 %v2321_v44  ;;  %v2296_v52 = vmax.f32 %v2200_v46, 0.0 }
 0x714   :  { %v2195_v0 = vadd.f32 %v3861_v16, %v2194_v51  ;;  %v2294_v31 = vmax.f32 %v2192_v49, 0.0 }
 0x715   :  { %v2297_v54 = vmax.f32 %v2203_v58, 0.0 }
 0x716   :  { %v2295_v28 = vmax.f32 %v2195_v0, 0.0 }
 0x717   :  { %v2323_v55 = vpack.c.bf16 %v2297_v54, %v2296_v52 }
 0x718   :  { %v2322_v56 = vpack.c.bf16 %v2295_v28, %v2294_v31  ;;  %v3269_v57 = vpop.f32.mrb[124].mxu1 }
 0x719   :  { %v2216_v59 = vadd.f32 %v3269_v57, %v3861_v16  ;;  %v2207_v60 = vpop.f32.mrb[125].mxu1 }
 0x71a   :  { %v2208_v61 = vadd.f32 %v3861_v16, %v2207_v60  ;;  %v3270_v62 = vpop.f32.mrb[126].mxu1  ;;  %3311 = vmatprep.mubr.bf16.mxu0 %v2322_v56 }
 0x71b   :  { %v2219_v63 = vadd.f32 %v3270_v62, %v3861_v16  ;;  %v2210_v1 = vpop.f32.mrb[127].mxu1  ;;  %3312 = vmatmul.mubr.bf16.gmra.mrb[120].mxu0 %v2323_v55  ;;  %v2300_v3 = vmax.f32 %v2216_v59, 0.0 }
 0x71c   :  { %v2211_v2 = vadd.f32 %v3861_v16, %v2210_v1  ;;  %v2298_v5 = vmax.f32 %v2208_v61, 0.0 }
 0x71d   :  { %v2301_v4 = vmax.f32 %v2219_v63, 0.0 }
 0x71e   :  { %v2299_v6 = vmax.f32 %v2211_v2, 0.0  ;;  %v3898_v2 = vld [vmem:[%s4063_s3 + $0x8] ss:$0 sm:$0xff] }
 0x71f   :  { %v2325_v7 = vpack.c.bf16 %v2301_v4, %v2300_v3 }
 0x720   :  { %v2324_v8 = vpack.c.bf16 %v2299_v6, %v2298_v5  ;;  %v3273_v9 = vpop.f32.mrb[128].mxu1 }
 0x721   :  { %v2232_v10 = vadd.f32 %v3273_v9, %v3861_v16  ;;  %v2223_v11 = vpop.f32.mrb[129].mxu1 }
 0x722   :  { %v2224_v12 = vadd.f32 %v3861_v16, %v2223_v11  ;;  %v3274_v13 = vpop.f32.mrb[130].mxu1  ;;  %3315 = vmatprep.mubr.bf16.mxu0 %v2324_v8 }
 0x723   :  { %v2235_v14 = vadd.f32 %v3274_v13, %v3861_v16  ;;  %v2226_v15 = vpop.f32.mrb[131].mxu1  ;;  %3316 = vmatmul.mubr.bf16.gmra.mrb[124].mxu0 %v2325_v7  ;;  %v2304_v18 = vmax.f32 %v2232_v10, 0.0 }
 0x724   :  { %v2227_v17 = vadd.f32 %v3861_v16, %v2226_v15  ;;  %v2302_v19 = vmax.f32 %v2224_v12, 0.0 }
 0x725   :  { %v2305_v29 = vmax.f32 %v2235_v14, 0.0 }
 0x726   :  { %v2303_v20 = vmax.f32 %v2227_v17, 0.0 }
 0x727   :  { %v2327_v21 = vpack.c.bf16 %v2305_v29, %v2304_v18 }
 0x728   :  { %v2326_v22 = vpack.c.bf16 %v2303_v20, %v2302_v19  ;;  %v3277_v23 = vpop.f32.mrb[132].mxu1 }
 0x729   :  { %v2248_v24 = vadd.f32 %v3277_v23, %v3861_v16  ;;  %v2239_v36 = vpop.f32.mrb[133].mxu1 }
 0x72a   :  { %v2240_v25 = vadd.f32 %v3861_v16, %v2239_v36  ;;  %v3278_v26 = vpop.f32.mrb[134].mxu1  ;;  %3319 = vmatprep.mubr.bf16.mxu0 %v2326_v22 }
 0x72b   :  { %v2251_v27 = vadd.f32 %v3278_v26, %v3861_v16  ;;  %v2242_v30 = vpop.f32.mrb[135].mxu1  ;;  %3320 = vmatmul.mubr.bf16.gmra.mrb[128].mxu0 %v2327_v21  ;;  %v2308_v42 = vmax.f32 %v2248_v24, 0.0 }
 0x72c   :  { %v2243_v32 = vadd.f32 %v3861_v16, %v2242_v30  ;;  %v2306_v34 = vmax.f32 %v2240_v25, 0.0 }
 0x72d   :  { %v2309_v33 = vmax.f32 %v2251_v27, 0.0 }
 0x72e   :  { %v2307_v35 = vmax.f32 %v2243_v32, 0.0 }
 0x72f   :  { %v2329_v37 = vpack.c.bf16 %v2309_v33, %v2308_v42 }
 0x730   :  { %v2328_v38 = vpack.c.bf16 %v2307_v35, %v2306_v34  ;;  %v3281_v48 = vpop.f32.mrb[136].mxu1 }
 0x731   :  { %v2264_v39 = vadd.f32 %v3281_v48, %v3861_v16  ;;  %v2255_v40 = vpop.f32.mrb[137].mxu1 }
 0x732   :  { %v2256_v41 = vadd.f32 %v3861_v16, %v2255_v40  ;;  %v3282_v43 = vpop.f32.mrb[138].mxu1  ;;  %3323 = vmatprep.mubr.bf16.mxu0 %v2328_v38 }
 0x733   :  { %v2267_v44 = vadd.f32 %v3282_v43, %v3861_v16  ;;  %v2258_v53 = vpop.f32.mrb[139].mxu1  ;;  %3324 = vmatmul.mubr.bf16.gmra.mrb[132].mxu0 %v2329_v37  ;;  %v2312_v46 = vmax.f32 %v2264_v39, 0.0 }
 0x734   :  { %v2259_v45 = vadd.f32 %v3861_v16, %v2258_v53  ;;  %v2310_v49 = vmax.f32 %v2256_v41, 0.0 }
 0x735   :  { %v2313_v47 = vmax.f32 %v2267_v44, 0.0 }
 0x736   :  { %v2311_v50 = vmax.f32 %v2259_v45, 0.0 }
 0x737   :  { %v2331_v58 = vpack.c.bf16 %v2313_v47, %v2312_v46 }
 0x738   :  { %v2330_v51 = vpack.c.bf16 %v2311_v50, %v2310_v49  ;;  %v3285_v0 = vpop.f32.mrb[140].mxu1 }
 0x739   :  { %v2280_v52 = vadd.f32 %v3285_v0, %v3861_v16  ;;  %v2271_v54 = vpop.f32.mrb[141].mxu1 }
 0x73a   :  { %v2272_v31 = vadd.f32 %v3861_v16, %v2271_v54  ;;  %v3286_v28 = vpop.f32.mrb[142].mxu1  ;;  %3327 = vmatprep.mubr.bf16.mxu0 %v2330_v51 }
 0x73b   :  { %v2283_v55 = vadd.f32 %v3286_v28, %v3861_v16  ;;  %v2274_v56 = vpop.f32.mrb[143].mxu1  ;;  %3328 = vmatmul.mubr.bf16.gmra.mrb[136].mxu0 %v2331_v58  ;;  %v2316_v59 = vmax.f32 %v2280_v52, 0.0 }
 0x73c   :  { %v2275_v57 = vadd.f32 %v3861_v16, %v2274_v56  ;;  %v2314_v61 = vmax.f32 %v2272_v31, 0.0 }
 0x73d   :  { %v2317_v60 = vmax.f32 %v2283_v55, 0.0 }
 0x73e   :  { %v2315_v62 = vmax.f32 %v2275_v57, 0.0 }
 0x73f   :  { %v2333_v63 = vpack.c.bf16 %v2317_v60, %v2316_v59 }
 0x740   :  { %v2332_v1 = vpack.c.bf16 %v2315_v62, %v2314_v61 }
 0x742   :  { %3331 = vmatprep.mubr.bf16.mxu0 %v2332_v1 }
 0x743   :  { %3332 = vmatmul.mubr.bf16.gmra.mrb[140].mxu0 %v2333_v63 }
 0x7de   :  { %v3305_v3 = vpop.f32.mrb[112].mxu0 }
 0x7df   :  { %v2450_v4 = vadd.f32 %v3305_v3, %v3898_v2  ;;  %v2441_v5 = vpop.f32.mrb[113].mxu0 }
 0x7e0   :  { %v2442_v16 = vadd.f32 %v3898_v2, %v2441_v5  ;;  %v3306_v6 = vpop.f32.mrb[114].mxu0 }
 0x7e1   :  { %2571 = vst.msk [vmem:[%s4064_s4 + $0x10] sm:$0xff] %vm2568_vm1, %v2450_v4  ;;  %v2453_v7 = vadd.f32 %v3306_v6, %v3898_v2  ;;  %v2444_v8 = vpop.f32.mrb[115].mxu0 }
 0x7e2   :  { %2569 = vst.msk [vmem:[%s4064_s4] sm:$0xff] %vm2568_vm1, %v2442_v16  ;;  %v2445_v9 = vadd.f32 %v3898_v2, %v2444_v8 }
 0x7e3   :  { %2572 = vst.msk [vmem:[%s4064_s4 + $0x18] sm:$0xff] %vm2568_vm1, %v2453_v7 }
 0x7e4   :  { %2570 = vst.msk [vmem:[%s4064_s4 + $0x8] sm:$0xff] %vm2568_vm1, %v2445_v9 }
 0x7e6   :  { %v3309_v10 = vpop.f32.mrb[116].mxu0 }
 0x7e7   :  { %v2466_v11 = vadd.f32 %v3309_v10, %v3898_v2  ;;  %v2457_v12 = vpop.f32.mrb[117].mxu0 }
 0x7e8   :  { %v2458_v13 = vadd.f32 %v3898_v2, %v2457_v12  ;;  %v3310_v14 = vpop.f32.mrb[118].mxu0 }
 0x7e9   :  { %2575 = vst.msk [vmem:[%s4064_s4 + $0x30] sm:$0xff] %vm2568_vm1, %v2466_v11  ;;  %v2469_v15 = vadd.f32 %v3310_v14, %v3898_v2  ;;  %v2460_v17 = vpop.f32.mrb[119].mxu0 }
 0x7ea   :  { %2573 = vst.msk [vmem:[%s4064_s4 + $0x20] sm:$0xff] %vm2568_vm1, %v2458_v13  ;;  %v2461_v18 = vadd.f32 %v3898_v2, %v2460_v17 }
 0x7eb   :  { %2576 = vst.msk [vmem:[%s4064_s4 + $0x38] sm:$0xff] %vm2568_vm1, %v2469_v15 }
 0x7ec   :  { %2574 = vst.msk [vmem:[%s4064_s4 + $0x28] sm:$0xff] %vm2568_vm1, %v2461_v18 }
 0x7ee   :  { %v3313_v29 = vpop.f32.mrb[120].mxu0 }
 0x7ef   :  { %v2482_v19 = vadd.f32 %v3313_v29, %v3898_v2  ;;  %v2473_v20 = vpop.f32.mrb[121].mxu0 }
 0x7f0   :  { %v2474_v21 = vadd.f32 %v3898_v2, %v2473_v20  ;;  %v3314_v22 = vpop.f32.mrb[122].mxu0 }
 0x7f1   :  { %2579 = vst.msk [vmem:[%s4064_s4 + $0x50] sm:$0xff] %vm2568_vm1, %v2482_v19  ;;  %v2485_v23 = vadd.f32 %v3314_v22, %v3898_v2  ;;  %v2476_v24 = vpop.f32.mrb[123].mxu0 }
 0x7f2   :  { %2577 = vst.msk [vmem:[%s4064_s4 + $0x40] sm:$0xff] %vm2568_vm1, %v2474_v21  ;;  %v2477_v36 = vadd.f32 %v3898_v2, %v2476_v24 }
 0x7f3   :  { %2580 = vst.msk [vmem:[%s4064_s4 + $0x58] sm:$0xff] %vm2568_vm1, %v2485_v23 }
 0x7f4   :  { %2578 = vst.msk [vmem:[%s4064_s4 + $0x48] sm:$0xff] %vm2568_vm1, %v2477_v36 }
 0x7f6   :  { %v3317_v25 = vpop.f32.mrb[124].mxu0 }
 0x7f7   :  { %v2498_v26 = vadd.f32 %v3317_v25, %v3898_v2  ;;  %v2489_v27 = vpop.f32.mrb[125].mxu0 }
 0x7f8   :  { %v2490_v30 = vadd.f32 %v3898_v2, %v2489_v27  ;;  %v3318_v32 = vpop.f32.mrb[126].mxu0 }
 0x7f9   :  { %2583 = vst.msk [vmem:[%s4064_s4 + $0x70] sm:$0xff] %vm2568_vm1, %v2498_v26  ;;  %v2501_v42 = vadd.f32 %v3318_v32, %v3898_v2  ;;  %v2492_v33 = vpop.f32.mrb[127].mxu0 }
 0x7fa   :  { %2581 = vst.msk [vmem:[%s4064_s4 + $0x60] sm:$0xff] %vm2568_vm1, %v2490_v30  ;;  %v2493_v34 = vadd.f32 %v3898_v2, %v2492_v33 }
 0x7fb   :  { %2584 = vst.msk [vmem:[%s4064_s4 + $0x78] sm:$0xff] %vm2568_vm1, %v2501_v42 }
 0x7fc   :  { %2582 = vst.msk [vmem:[%s4064_s4 + $0x68] sm:$0xff] %vm2568_vm1, %v2493_v34 }
 0x7fe   :  { %v3321_v35 = vpop.f32.mrb[128].mxu0 }
 0x7ff   :  { %v2514_v37 = vadd.f32 %v3321_v35, %v3898_v2  ;;  %v2505_v38 = vpop.f32.mrb[129].mxu0 }
 0x800   :  { %v2506_v48 = vadd.f32 %v3898_v2, %v2505_v38  ;;  %v3322_v39 = vpop.f32.mrb[130].mxu0 }
 0x801   :  { %2587 = vst.msk [vmem:[%s4064_s4 + $0x90] sm:$0xff] %vm2568_vm1, %v2514_v37  ;;  %v2517_v40 = vadd.f32 %v3322_v39, %v3898_v2  ;;  %v2508_v41 = vpop.f32.mrb[131].mxu0 }
 0x802   :  { %2585 = vst.msk [vmem:[%s4064_s4 + $0x80] sm:$0xff] %vm2568_vm1, %v2506_v48  ;;  %v2509_v43 = vadd.f32 %v3898_v2, %v2508_v41 }
 0x803   :  { %2588 = vst.msk [vmem:[%s4064_s4 + $0x98] sm:$0xff] %vm2568_vm1, %v2517_v40 }
 0x804   :  { %2586 = vst.msk [vmem:[%s4064_s4 + $0x88] sm:$0xff] %vm2568_vm1, %v2509_v43 }
 0x806   :  { %v3325_v44 = vpop.f32.mrb[132].mxu0 }
 0x807   :  { %v2530_v53 = vadd.f32 %v3325_v44, %v3898_v2  ;;  %v2521_v45 = vpop.f32.mrb[133].mxu0 }
 0x808   :  { %v2522_v46 = vadd.f32 %v3898_v2, %v2521_v45  ;;  %v3326_v47 = vpop.f32.mrb[134].mxu0 }
 0x809   :  { %2591 = vst.msk [vmem:[%s4064_s4 + $0xb0] sm:$0xff] %vm2568_vm1, %v2530_v53  ;;  %v2533_v49 = vadd.f32 %v3326_v47, %v3898_v2  ;;  %v2524_v50 = vpop.f32.mrb[135].mxu0 }
 0x80a   :  { %2589 = vst.msk [vmem:[%s4064_s4 + $0xa0] sm:$0xff] %vm2568_vm1, %v2522_v46  ;;  %v2525_v58 = vadd.f32 %v3898_v2, %v2524_v50 }
 0x80b   :  { %2592 = vst.msk [vmem:[%s4064_s4 + $0xb8] sm:$0xff] %vm2568_vm1, %v2533_v49 }
 0x80c   :  { %2590 = vst.msk [vmem:[%s4064_s4 + $0xa8] sm:$0xff] %vm2568_vm1, %v2525_v58 }
 0x80e   :  { %v3329_v51 = vpop.f32.mrb[136].mxu0 }
 0x80f   :  { %v2546_v0 = vadd.f32 %v3329_v51, %v3898_v2  ;;  %v2537_v52 = vpop.f32.mrb[137].mxu0 }
 0x810   :  { %v2538_v54 = vadd.f32 %v3898_v2, %v2537_v52  ;;  %v3330_v31 = vpop.f32.mrb[138].mxu0 }
 0x811   :  { %2595 = vst.msk [vmem:[%s4064_s4 + $0xd0] sm:$0xff] %vm2568_vm1, %v2546_v0  ;;  %v2549_v28 = vadd.f32 %v3330_v31, %v3898_v2  ;;  %v2540_v55 = vpop.f32.mrb[139].mxu0 }
 0x812   :  { %2593 = vst.msk [vmem:[%s4064_s4 + $0xc0] sm:$0xff] %vm2568_vm1, %v2538_v54  ;;  %v2541_v56 = vadd.f32 %v3898_v2, %v2540_v55 }
 0x813   :  { %2596 = vst.msk [vmem:[%s4064_s4 + $0xd8] sm:$0xff] %vm2568_vm1, %v2549_v28 }
 0x814   :  { %2594 = vst.msk [vmem:[%s4064_s4 + $0xc8] sm:$0xff] %vm2568_vm1, %v2541_v56 }
 0x816   :  { %v3333_v57 = vpop.f32.mrb[140].mxu0 }
 0x817   :  { %v2562_v59 = vadd.f32 %v3333_v57, %v3898_v2  ;;  %v2553_v60 = vpop.f32.mrb[141].mxu0 }
 0x818   :  { %v2554_v61 = vadd.f32 %v3898_v2, %v2553_v60  ;;  %v3334_v62 = vpop.f32.mrb[142].mxu0 }
 0x819   :  { %2599 = vst.msk [vmem:[%s4064_s4 + $0xf0] sm:$0xff] %vm2568_vm1, %v2562_v59  ;;  %v2565_v63 = vadd.f32 %v3334_v62, %v3898_v2  ;;  %v2556_v1 = vpop.f32.mrb[143].mxu0 }
 0x81a   :  { %2597 = vst.msk [vmem:[%s4064_s4 + $0xe0] sm:$0xff] %vm2568_vm1, %v2554_v61  ;;  %v2557_v3 = vadd.f32 %v3898_v2, %v2556_v1 }
 0x81b   :  { %2600 = vst.msk [vmem:[%s4064_s4 + $0xf8] sm:$0xff] %vm2568_vm1, %v2565_v63 }
 0x81c   :  { %2598 = vst.msk [vmem:[%s4064_s4 + $0xe8] sm:$0xff] %vm2568_vm1, %v2557_v3 }
 0x81d   :  { %2605 = vsyncpa [#allocation3], 1 }

</bundles_post_ra>
